<compile_context>
chip_gen: v7x
topology: tpu7x:2x2x1
jax: 0.10.0
libtpu: 0.0.40
codegen_flags: <defaults>
</compile_context>

<pallas_src>
import jax
import jax.numpy as jnp
from jax import lax
from jax.experimental import pallas as pl
from jax.experimental.pallas import tpu as pltpu

FEAT = 128            # per-branch feature width -> cat gives 256 (matches nn.Linear(256, 64))
HIDDEN = 64
HIDDEN_PAD = 128      # lane/sublane-dense hidden width (zero-padded; logits unchanged)
NUM_CLASSES = 8
OUT_PAD = 128         # lane-dense classifier output rows (feature-major), sliced in wrapper
LANE = 128            # batch (lane) alignment in feature-major layout
TILE_B = 1024         # target batch tile (multiple of LANE)


# ----------------------------------------------------------------------------
# Pallas kernel: fused residual-fusion + LayerNorm + MLP classifier head
# All tensors are feature-major: (feature, batch_tile). Reductions are over axis 0.
# ----------------------------------------------------------------------------
def fusion_head_kernel(ms3_ref, pan3_ref, ms4_ref, pan4_ref, ms5_ref, pan5_ref,
                       w1t_ref, b1_ref, w2t_ref, b2_ref, out_ref):
    def l2norm(x):
        # F.normalize(x, dim=feature): x / max(||x||_2, 1e-12) == x * rsqrt(max(sum(x^2), 1e-24))
        ss = jnp.sum(x * x, axis=0, keepdims=True)          # (1, tile) sublane reduce
        return x * lax.rsqrt(jnp.maximum(ss, 1e-24))

    ms3 = ms3_ref[...]
    pan3 = pan3_ref[...]
    ms4 = ms4_ref[...]
    pan4 = pan4_ref[...]
    ms5 = ms5_ref[...]
    pan5 = pan5_ref[...]

    r3 = l2norm(ms3 - pan3)

    # TODO(synk): model2.ResidualGate source unavailable; stand-in gate:
    #             g = sigmoid(mean(x * r, over feature dim, keepdim)).
    g3 = jax.nn.sigmoid(jnp.mean(0.5 * (ms4 + pan4) * r3, axis=0, keepdims=True))

    ms4_mod = l2norm(ms4 - g3 * r3)
    pan4_mod = l2norm(pan4 + g3 * r3)
    r4 = l2norm(ms4_mod - pan4_mod)

    # TODO(synk): model2.AlignGRU source unavailable; stand-in = normalized mean of [r3, r4].
    r4_1 = l2norm(0.5 * (r3 + r4))

    # TODO(synk): gate4 is the same unavailable ResidualGate; same stand-in as gate3.
    g4 = jax.nn.sigmoid(jnp.mean(0.5 * (ms5 + pan5) * r4_1, axis=0, keepdims=True))

    ms5_mod = l2norm(ms5 - g4 * r4_1)
    pan5_mod = l2norm(pan5 + g4 * r4_1)

    # feature = cat([ms5_mod, pan5_mod]); LayerNorm(256) stats computed over the two
    # 128-wide halves directly (no concat materialization; biased variance as in PyTorch).
    # LayerNorm gamma/beta are folded into w1t/b1 at parameter-build time.
    inv_n = 1.0 / (2.0 * FEAT)
    mu = (jnp.sum(ms5_mod, axis=0, keepdims=True) +
          jnp.sum(pan5_mod, axis=0, keepdims=True)) * inv_n
    da = ms5_mod - mu
    db = pan5_mod - mu
    var = (jnp.sum(da * da, axis=0, keepdims=True) +
           jnp.sum(db * db, axis=0, keepdims=True)) * inv_n
    inv_std = lax.rsqrt(var + 1e-5)
    fa = da * inv_std                                        # normalized first half  (128, tile)
    fb = db * inv_std                                        # normalized second half (128, tile)

    # add_block: Linear(256,64) with LayerNorm affine + eval-mode BatchNorm1d folded in,
    # hidden padded to 128; two 128x128 @ 128xtile MXU matmuls over the halves.
    h = (jnp.dot(w1t_ref[:, 0:FEAT], fa, preferred_element_type=jnp.float32) +
         jnp.dot(w1t_ref[:, FEAT:2 * FEAT], fb, preferred_element_type=jnp.float32) +
         b1_ref[...])
    # ReLU(True)
    h = jnp.maximum(h, 0.0)
    # Dropout(p=0.5): identity in eval mode.
    # Linear(64, num_classes), padded to (128, 128); output feature-major (OUT_PAD, tile).
    out_ref[...] = jnp.dot(w2t_ref[...], h, preferred_element_type=jnp.float32) + b2_ref[...]


# ----------------------------------------------------------------------------
# Parameters (head params are the real Net layers; branch projections are stand-ins)
# ----------------------------------------------------------------------------
def make_params(key):
    ks = jax.random.split(key, 8)
    p = {}
    # TODO(synk): MS_Model / PAN_Model / DictionaryRepresentationModule_{m,p} sources are
    #             external; stand-in = global-average-pool over NCHW spatial dims followed
    #             by per-stage tanh(Linear) projections to FEAT dims.
    p["ms_proj"] = [jax.random.normal(ks[i], (4, FEAT), jnp.float32) * 0.1 for i in range(3)]
    p["pan_proj"] = [jax.random.normal(ks[3 + i], (1, FEAT), jnp.float32) * 0.1 for i in range(3)]

    # nn.LayerNorm(256) affine (default init).
    ln_g = jnp.ones((2 * FEAT,), jnp.float32)
    ln_b = jnp.zeros((2 * FEAT,), jnp.float32)

    # add_block: Linear(256,64) + BatchNorm1d(64) (eval) + ReLU + Dropout + Linear(64,nc).
    w1 = jax.random.normal(ks[6], (2 * FEAT, HIDDEN), jnp.float32) * (1.0 / jnp.sqrt(2.0 * FEAT))
    b1 = jnp.zeros((HIDDEN,), jnp.float32)
    bn_g = jnp.ones((HIDDEN,), jnp.float32)
    bn_b = jnp.zeros((HIDDEN,), jnp.float32)
    bn_m = jnp.zeros((HIDDEN,), jnp.float32)     # running_mean
    bn_v = jnp.ones((HIDDEN,), jnp.float32)      # running_var

    # Fold eval-mode BN into Linear(256,64), then fold LayerNorm affine into the result:
    #   h = ((x_hat*ln_g + ln_b) @ w1_bn + b1_bn)  ==  x_hat @ (ln_g[:,None]*w1_bn) + (ln_b@w1_bn + b1_bn)
    scale = bn_g / jnp.sqrt(bn_v + 1e-5)
    w1_bn = w1 * scale[None, :]
    b1_bn = (b1 - bn_m) * scale + bn_b
    w1_f = ln_g[:, None] * w1_bn                              # (256, 64)
    b1_f = ln_b @ w1_bn + b1_bn                               # (64,)

    # Feature-major, hidden padded to 128 (padded rows/cols are exact zeros).
    w1t = jnp.zeros((HIDDEN_PAD, 2 * FEAT), jnp.float32).at[:HIDDEN, :].set(w1_f.T)
    b1c = jnp.zeros((HIDDEN_PAD, 1), jnp.float32).at[:HIDDEN, 0].set(b1_f)

    w2 = jax.random.normal(ks[7], (HIDDEN, NUM_CLASSES), jnp.float32) * (1.0 / jnp.sqrt(1.0 * HIDDEN))
    b2 = jnp.zeros((NUM_CLASSES,), jnp.float32)
    w2t = jnp.zeros((OUT_PAD, HIDDEN_PAD), jnp.float32).at[:NUM_CLASSES, :HIDDEN].set(w2.T)
    b2c = jnp.zeros((OUT_PAD, 1), jnp.float32).at[:NUM_CLASSES, 0].set(b2)

    p["w1t"], p["b1c"], p["w2t"], p["b2c"] = w1t, b1c, w2t, b2c
    return p


def standin_branch_features_fm(x_nchw, projs):
    # x_nchw: (B, C, H, W) -> pooled (B, C) -> stage-3/4/5 stand-in features, FEATURE-MAJOR (FEAT, B).
    pooled = jnp.mean(x_nchw, axis=(2, 3))
    return [jnp.tanh(jnp.einsum('bc,cf->fb', pooled, w)) for w in projs]


# ----------------------------------------------------------------------------
# Wrapper: stand-in extraction (plain JAX) + batch-gridded fused Pallas head
# ----------------------------------------------------------------------------
@jax.jit
def net_forward(ms, pan, params):
    ms3, ms4, ms5 = standin_branch_features_fm(ms, params["ms_proj"])
    pan3, pan4, pan5 = standin_branch_features_fm(pan, params["pan_proj"])

    B = ms.shape[0]
    b_pad = -(-B // LANE) * LANE                         # batch rounded up to lane multiple
    # >=2 tiles (when the padded batch allows) so v7x's two TensorCores both get work,
    # while keeping tile <= TILE_B and padding waste minimal.
    n_tiles = max(-(-b_pad // TILE_B), 2 if b_pad >= 2 * LANE else 1)
    tile = -(-b_pad // (n_tiles * LANE)) * LANE          # lane-aligned tile width
    Bp = n_tiles * tile

    def pad_cols(x):
        return x if x.shape[1] == Bp else jnp.pad(x, ((0, 0), (0, Bp - x.shape[1])))

    feats = [pad_cols(x) for x in (ms3, pan3, ms4, pan4, ms5, pan5)]

    feat_spec = pl.BlockSpec((FEAT, tile), lambda i: (0, i))

    def full_spec(shape):
        return pl.BlockSpec(shape, lambda i: (0, 0))

    out_full = pl.pallas_call(
        fusion_head_kernel,
        out_shape=jax.ShapeDtypeStruct((OUT_PAD, Bp), jnp.float32),
        grid=(n_tiles,),
        in_specs=[feat_spec] * 6 + [
            full_spec((HIDDEN_PAD, 2 * FEAT)),           # LN+BN-folded Linear(256,64) weight^T (padded)
            full_spec((HIDDEN_PAD, 1)),                  # folded bias (column, padded)
            full_spec((OUT_PAD, HIDDEN_PAD)),            # padded Linear(64,nc) weight^T
            full_spec((OUT_PAD, 1)),                     # padded bias (column)
        ],
        out_specs=pl.BlockSpec((OUT_PAD, tile), lambda i: (0, i)),
        compiler_params=pltpu.CompilerParams(
            dimension_semantics=("parallel",),
            vmem_limit_bytes=32 * 1024 * 1024,
        ),
    )(*feats, params["w1t"], params["b1c"], params["w2t"], params["b2c"])

    # Back to PyTorch layout: (B, num_classes).
    return out_full[:NUM_CLASSES, :B].T


if __name__ == "__main__":
    key = jax.random.PRNGKey(0)
    k_ms, k_pan, k_par = jax.random.split(key, 3)

    B = 2
    ms = jax.random.normal(k_ms, (B, 4, 16, 16), jnp.float32)    # NCHW multispectral
    pan = jax.random.normal(k_pan, (B, 1, 64, 64), jnp.float32)  # NCHW panchromatic (4x spatial)

    params = make_params(k_par)

    out = net_forward(ms, pan, params)
    out = jax.block_until_ready(out)
    assert out.shape == (B, NUM_CLASSES)
    assert bool(jnp.all(jnp.isfinite(out)))
    print("KERNEL_OK")
</pallas_src>

<mosaic_0001>
module attributes {stable_mosaic.version = 11 : i64} {
  func.func @fusion_head_kernel(%arg0: i32, %arg1: memref<128x128xf32, #tpu.memory_space<vmem>>, %arg2: memref<128x128xf32, #tpu.memory_space<vmem>>, %arg3: memref<128x128xf32, #tpu.memory_space<vmem>>, %arg4: memref<128x128xf32, #tpu.memory_space<vmem>>, %arg5: memref<128x128xf32, #tpu.memory_space<vmem>>, %arg6: memref<128x128xf32, #tpu.memory_space<vmem>>, %arg7: memref<128x256xf32, #tpu.memory_space<vmem>>, %arg8: memref<128x1xf32, #tpu.memory_space<vmem>>, %arg9: memref<128x128xf32, #tpu.memory_space<vmem>>, %arg10: memref<128x1xf32, #tpu.memory_space<vmem>>, %arg11: memref<128x128xf32, #tpu.memory_space<vmem>>) attributes {dimension_semantics = [#tpu.dimension_semantics<parallel>], iteration_bounds = array<i64: 1>, scalar_prefetch = 0 : i64, scratch_operands = 0 : i64, tpu.core_type = #tpu.core_type<tc>, window_params = [{transform_indices = @transform_0, window_bounds = array<i64: 128, 128>}, {transform_indices = @transform_1, window_bounds = array<i64: 128, 128>}, {transform_indices = @transform_2, window_bounds = array<i64: 128, 128>}, {transform_indices = @transform_3, window_bounds = array<i64: 128, 128>}, {transform_indices = @transform_4, window_bounds = array<i64: 128, 128>}, {transform_indices = @transform_5, window_bounds = array<i64: 128, 128>}, {pipeline_mode = #tpu.pipeline_mode<synchronous>, transform_indices = @transform_6, window_bounds = array<i64: 128, 256>}, {pipeline_mode = #tpu.pipeline_mode<synchronous>, transform_indices = @transform_7, window_bounds = array<i64: 128, 1>}, {pipeline_mode = #tpu.pipeline_mode<synchronous>, transform_indices = @transform_8, window_bounds = array<i64: 128, 128>}, {pipeline_mode = #tpu.pipeline_mode<synchronous>, transform_indices = @transform_9, window_bounds = array<i64: 128, 1>}, {transform_indices = @transform_10, window_bounds = array<i64: 128, 128>}]} {
    %c0 = arith.constant 0 : index
    %c0_0 = arith.constant 0 : index
    %0 = vector.load %arg1[%c0, %c0_0] : memref<128x128xf32, #tpu.memory_space<vmem>>, vector<128x128xf32>
    %c0_1 = arith.constant 0 : index
    %c0_2 = arith.constant 0 : index
    %1 = vector.load %arg2[%c0_1, %c0_2] : memref<128x128xf32, #tpu.memory_space<vmem>>, vector<128x128xf32>
    %c0_3 = arith.constant 0 : index
    %c0_4 = arith.constant 0 : index
    %2 = vector.load %arg3[%c0_3, %c0_4] : memref<128x128xf32, #tpu.memory_space<vmem>>, vector<128x128xf32>
    %c0_5 = arith.constant 0 : index
    %c0_6 = arith.constant 0 : index
    %3 = vector.load %arg4[%c0_5, %c0_6] : memref<128x128xf32, #tpu.memory_space<vmem>>, vector<128x128xf32>
    %c0_7 = arith.constant 0 : index
    %c0_8 = arith.constant 0 : index
    %4 = vector.load %arg5[%c0_7, %c0_8] : memref<128x128xf32, #tpu.memory_space<vmem>>, vector<128x128xf32>
    %c0_9 = arith.constant 0 : index
    %c0_10 = arith.constant 0 : index
    %5 = vector.load %arg6[%c0_9, %c0_10] : memref<128x128xf32, #tpu.memory_space<vmem>>, vector<128x128xf32>
    %6 = arith.subf %0, %1 : vector<128x128xf32>
    %7 = arith.mulf %6, %6 : vector<128x128xf32>
    %cst = arith.constant dense<0.000000e+00> : vector<128xf32>
    %8 = vector.multi_reduction <add>, %7, %cst [0] : vector<128x128xf32> to vector<128xf32>
    %9 = vector.shape_cast %8 : vector<128xf32> to vector<1x128xf32>
    %cst_11 = arith.constant 1.000000e-24 : f32
    %10 = vector.broadcast %cst_11 : f32 to vector<1x128xf32>
    %11 = arith.maximumf %9, %10 : vector<1x128xf32>
    %12 = math.rsqrt %11 : vector<1x128xf32>
    %13 = vector.broadcast %12 : vector<1x128xf32> to vector<128x128xf32>
    %14 = arith.mulf %6, %13 : vector<128x128xf32>
    %15 = arith.addf %2, %3 : vector<128x128xf32>
    %cst_12 = arith.constant 5.000000e-01 : f32
    %16 = vector.broadcast %cst_12 : f32 to vector<128x128xf32>
    %17 = arith.mulf %16, %15 : vector<128x128xf32>
    %18 = arith.mulf %17, %14 : vector<128x128xf32>
    %cst_13 = arith.constant dense<0.000000e+00> : vector<128xf32>
    %19 = vector.multi_reduction <add>, %18, %cst_13 [0] : vector<128x128xf32> to vector<128xf32>
    %20 = vector.shape_cast %19 : vector<128xf32> to vector<1x128xf32>
    %cst_14 = arith.constant 1.280000e+02 : f32
    %21 = vector.broadcast %cst_14 : f32 to vector<1x128xf32>
    %22 = arith.divf %20, %21 : vector<1x128xf32>
    %23 = arith.negf %22 : vector<1x128xf32>
    %24 = math.exp %23 : vector<1x128xf32>
    %cst_15 = arith.constant 1.000000e+00 : f32
    %25 = vector.broadcast %cst_15 : f32 to vector<1x128xf32>
    %26 = arith.addf %25, %24 : vector<1x128xf32>
    %27 = arith.divf %25, %26 : vector<1x128xf32>
    %28 = vector.broadcast %27 : vector<1x128xf32> to vector<128x128xf32>
    %29 = arith.mulf %28, %14 : vector<128x128xf32>
    %30 = arith.subf %2, %29 : vector<128x128xf32>
    %31 = arith.mulf %30, %30 : vector<128x128xf32>
    %cst_16 = arith.constant dense<0.000000e+00> : vector<128xf32>
    %32 = vector.multi_reduction <add>, %31, %cst_16 [0] : vector<128x128xf32> to vector<128xf32>
    %33 = vector.shape_cast %32 : vector<128xf32> to vector<1x128xf32>
    %cst_17 = arith.constant 1.000000e-24 : f32
    %34 = vector.broadcast %cst_17 : f32 to vector<1x128xf32>
    %35 = arith.maximumf %33, %34 : vector<1x128xf32>
    %36 = math.rsqrt %35 : vector<1x128xf32>
    %37 = vector.broadcast %36 : vector<1x128xf32> to vector<128x128xf32>
    %38 = arith.mulf %30, %37 : vector<128x128xf32>
    %39 = vector.broadcast %27 : vector<1x128xf32> to vector<128x128xf32>
    %40 = arith.mulf %39, %14 : vector<128x128xf32>
    %41 = arith.addf %3, %40 : vector<128x128xf32>
    %42 = arith.mulf %41, %41 : vector<128x128xf32>
    %cst_18 = arith.constant dense<0.000000e+00> : vector<128xf32>
    %43 = vector.multi_reduction <add>, %42, %cst_18 [0] : vector<128x128xf32> to vector<128xf32>
    %44 = vector.shape_cast %43 : vector<128xf32> to vector<1x128xf32>
    %cst_19 = arith.constant 1.000000e-24 : f32
    %45 = vector.broadcast %cst_19 : f32 to vector<1x128xf32>
    %46 = arith.maximumf %44, %45 : vector<1x128xf32>
    %47 = math.rsqrt %46 : vector<1x128xf32>
    %48 = vector.broadcast %47 : vector<1x128xf32> to vector<128x128xf32>
    %49 = arith.mulf %41, %48 : vector<128x128xf32>
    %50 = arith.subf %38, %49 : vector<128x128xf32>
    %51 = arith.mulf %50, %50 : vector<128x128xf32>
    %cst_20 = arith.constant dense<0.000000e+00> : vector<128xf32>
    %52 = vector.multi_reduction <add>, %51, %cst_20 [0] : vector<128x128xf32> to vector<128xf32>
    %53 = vector.shape_cast %52 : vector<128xf32> to vector<1x128xf32>
    %cst_21 = arith.constant 1.000000e-24 : f32
    %54 = vector.broadcast %cst_21 : f32 to vector<1x128xf32>
    %55 = arith.maximumf %53, %54 : vector<1x128xf32>
    %56 = math.rsqrt %55 : vector<1x128xf32>
    %57 = vector.broadcast %56 : vector<1x128xf32> to vector<128x128xf32>
    %58 = arith.mulf %50, %57 : vector<128x128xf32>
    %59 = arith.addf %14, %58 : vector<128x128xf32>
    %cst_22 = arith.constant 5.000000e-01 : f32
    %60 = vector.broadcast %cst_22 : f32 to vector<128x128xf32>
    %61 = arith.mulf %60, %59 : vector<128x128xf32>
    %62 = arith.mulf %61, %61 : vector<128x128xf32>
    %cst_23 = arith.constant dense<0.000000e+00> : vector<128xf32>
    %63 = vector.multi_reduction <add>, %62, %cst_23 [0] : vector<128x128xf32> to vector<128xf32>
    %64 = vector.shape_cast %63 : vector<128xf32> to vector<1x128xf32>
    %cst_24 = arith.constant 1.000000e-24 : f32
    %65 = vector.broadcast %cst_24 : f32 to vector<1x128xf32>
    %66 = arith.maximumf %64, %65 : vector<1x128xf32>
    %67 = math.rsqrt %66 : vector<1x128xf32>
    %68 = vector.broadcast %67 : vector<1x128xf32> to vector<128x128xf32>
    %69 = arith.mulf %61, %68 : vector<128x128xf32>
    %70 = arith.addf %4, %5 : vector<128x128xf32>
    %cst_25 = arith.constant 5.000000e-01 : f32
    %71 = vector.broadcast %cst_25 : f32 to vector<128x128xf32>
    %72 = arith.mulf %71, %70 : vector<128x128xf32>
    %73 = arith.mulf %72, %69 : vector<128x128xf32>
    %cst_26 = arith.constant dense<0.000000e+00> : vector<128xf32>
    %74 = vector.multi_reduction <add>, %73, %cst_26 [0] : vector<128x128xf32> to vector<128xf32>
    %75 = vector.shape_cast %74 : vector<128xf32> to vector<1x128xf32>
    %cst_27 = arith.constant 1.280000e+02 : f32
    %76 = vector.broadcast %cst_27 : f32 to vector<1x128xf32>
    %77 = arith.divf %75, %76 : vector<1x128xf32>
    %78 = arith.negf %77 : vector<1x128xf32>
    %79 = math.exp %78 : vector<1x128xf32>
    %cst_28 = arith.constant 1.000000e+00 : f32
    %80 = vector.broadcast %cst_28 : f32 to vector<1x128xf32>
    %81 = arith.addf %80, %79 : vector<1x128xf32>
    %82 = arith.divf %80, %81 : vector<1x128xf32>
    %83 = vector.broadcast %82 : vector<1x128xf32> to vector<128x128xf32>
    %84 = arith.mulf %83, %69 : vector<128x128xf32>
    %85 = arith.subf %4, %84 : vector<128x128xf32>
    %86 = arith.mulf %85, %85 : vector<128x128xf32>
    %cst_29 = arith.constant dense<0.000000e+00> : vector<128xf32>
    %87 = vector.multi_reduction <add>, %86, %cst_29 [0] : vector<128x128xf32> to vector<128xf32>
    %88 = vector.shape_cast %87 : vector<128xf32> to vector<1x128xf32>
    %cst_30 = arith.constant 1.000000e-24 : f32
    %89 = vector.broadcast %cst_30 : f32 to vector<1x128xf32>
    %90 = arith.maximumf %88, %89 : vector<1x128xf32>
    %91 = math.rsqrt %90 : vector<1x128xf32>
    %92 = vector.broadcast %91 : vector<1x128xf32> to vector<128x128xf32>
    %93 = arith.mulf %85, %92 : vector<128x128xf32>
    %94 = vector.broadcast %82 : vector<1x128xf32> to vector<128x128xf32>
    %95 = arith.mulf %94, %69 : vector<128x128xf32>
    %96 = arith.addf %5, %95 : vector<128x128xf32>
    %97 = arith.mulf %96, %96 : vector<128x128xf32>
    %cst_31 = arith.constant dense<0.000000e+00> : vector<128xf32>
    %98 = vector.multi_reduction <add>, %97, %cst_31 [0] : vector<128x128xf32> to vector<128xf32>
    %99 = vector.shape_cast %98 : vector<128xf32> to vector<1x128xf32>
    %cst_32 = arith.constant 1.000000e-24 : f32
    %100 = vector.broadcast %cst_32 : f32 to vector<1x128xf32>
    %101 = arith.maximumf %99, %100 : vector<1x128xf32>
    %102 = math.rsqrt %101 : vector<1x128xf32>
    %103 = vector.broadcast %102 : vector<1x128xf32> to vector<128x128xf32>
    %104 = arith.mulf %96, %103 : vector<128x128xf32>
    %cst_33 = arith.constant dense<0.000000e+00> : vector<128xf32>
    %105 = vector.multi_reduction <add>, %93, %cst_33 [0] : vector<128x128xf32> to vector<128xf32>
    %106 = vector.shape_cast %105 : vector<128xf32> to vector<1x128xf32>
    %cst_34 = arith.constant dense<0.000000e+00> : vector<128xf32>
    %107 = vector.multi_reduction <add>, %104, %cst_34 [0] : vector<128x128xf32> to vector<128xf32>
    %108 = vector.shape_cast %107 : vector<128xf32> to vector<1x128xf32>
    %109 = arith.addf %106, %108 : vector<1x128xf32>
    %cst_35 = arith.constant 3.906250e-03 : f32
    %110 = vector.broadcast %cst_35 : f32 to vector<1x128xf32>
    %111 = arith.mulf %109, %110 : vector<1x128xf32>
    %112 = vector.broadcast %111 : vector<1x128xf32> to vector<128x128xf32>
    %113 = arith.subf %93, %112 : vector<128x128xf32>
    %114 = vector.broadcast %111 : vector<1x128xf32> to vector<128x128xf32>
    %115 = arith.subf %104, %114 : vector<128x128xf32>
    %116 = arith.mulf %113, %113 : vector<128x128xf32>
    %cst_36 = arith.constant dense<0.000000e+00> : vector<128xf32>
    %117 = vector.multi_reduction <add>, %116, %cst_36 [0] : vector<128x128xf32> to vector<128xf32>
    %118 = vector.shape_cast %117 : vector<128xf32> to vector<1x128xf32>
    %119 = arith.mulf %115, %115 : vector<128x128xf32>
    %cst_37 = arith.constant dense<0.000000e+00> : vector<128xf32>
    %120 = vector.multi_reduction <add>, %119, %cst_37 [0] : vector<128x128xf32> to vector<128xf32>
    %121 = vector.shape_cast %120 : vector<128xf32> to vector<1x128xf32>
    %122 = arith.addf %118, %121 : vector<1x128xf32>
    %cst_38 = arith.constant 3.906250e-03 : f32
    %123 = vector.broadcast %cst_38 : f32 to vector<1x128xf32>
    %124 = arith.mulf %122, %123 : vector<1x128xf32>
    %cst_39 = arith.constant 9.99999974E-6 : f32
    %125 = vector.broadcast %cst_39 : f32 to vector<1x128xf32>
    %126 = arith.addf %124, %125 : vector<1x128xf32>
    %127 = math.rsqrt %126 : vector<1x128xf32>
    %128 = vector.broadcast %127 : vector<1x128xf32> to vector<128x128xf32>
    %129 = arith.mulf %113, %128 : vector<128x128xf32>
    %130 = vector.broadcast %127 : vector<1x128xf32> to vector<128x128xf32>
    %131 = arith.mulf %115, %130 : vector<128x128xf32>
    %c0_40 = arith.constant 0 : index
    %c0_41 = arith.constant 0 : index
    %132 = vector.load %arg7[%c0_40, %c0_41] : memref<128x256xf32, #tpu.memory_space<vmem>>, vector<128x128xf32>
    %cst_42 = arith.constant dense<0.000000e+00> : vector<128x128xf32>
    %133 = tpu.matmul %132, %129, %cst_42 {dimension_numbers = #tpu.dot_dimension_numbers<[1], [0], [0], [1], [0, 0, 1, 1], [], []>} : vector<128x128xf32>, vector<128x128xf32>, vector<128x128xf32> -> vector<128x128xf32>
    %c0_43 = arith.constant 0 : index
    %c128 = arith.constant 128 : index
    %134 = vector.load %arg7[%c0_43, %c128] : memref<128x256xf32, #tpu.memory_space<vmem>>, vector<128x128xf32>
    %cst_44 = arith.constant dense<0.000000e+00> : vector<128x128xf32>
    %135 = tpu.matmul %134, %131, %cst_44 {dimension_numbers = #tpu.dot_dimension_numbers<[1], [0], [0], [1], [0, 0, 1, 1], [], []>} : vector<128x128xf32>, vector<128x128xf32>, vector<128x128xf32> -> vector<128x128xf32>
    %136 = arith.addf %133, %135 : vector<128x128xf32>
    %c0_45 = arith.constant 0 : index
    %c0_46 = arith.constant 0 : index
    %137 = vector.load %arg8[%c0_45, %c0_46] : memref<128x1xf32, #tpu.memory_space<vmem>>, vector<128x1xf32>
    %138 = vector.broadcast %137 : vector<128x1xf32> to vector<128x128xf32>
    %139 = arith.addf %136, %138 : vector<128x128xf32>
    %cst_47 = arith.constant 0.000000e+00 : f32
    %140 = vector.broadcast %cst_47 : f32 to vector<128x128xf32>
    %141 = arith.maximumf %139, %140 : vector<128x128xf32>
    %c0_48 = arith.constant 0 : index
    %c0_49 = arith.constant 0 : index
    %142 = vector.load %arg9[%c0_48, %c0_49] : memref<128x128xf32, #tpu.memory_space<vmem>>, vector<128x128xf32>
    %cst_50 = arith.constant dense<0.000000e+00> : vector<128x128xf32>
    %143 = tpu.matmul %142, %141, %cst_50 {dimension_numbers = #tpu.dot_dimension_numbers<[1], [0], [0], [1], [0, 0, 1, 1], [], []>} : vector<128x128xf32>, vector<128x128xf32>, vector<128x128xf32> -> vector<128x128xf32>
    %c0_51 = arith.constant 0 : index
    %c0_52 = arith.constant 0 : index
    %144 = vector.load %arg10[%c0_51, %c0_52] : memref<128x1xf32, #tpu.memory_space<vmem>>, vector<128x1xf32>
    %145 = vector.broadcast %144 : vector<128x1xf32> to vector<128x128xf32>
    %146 = arith.addf %143, %145 : vector<128x128xf32>
    %c0_53 = arith.constant 0 : index
    %c0_54 = arith.constant 0 : index
    %147 = vector.load %arg11[%c0_53, %c0_54] : memref<128x128xf32, #tpu.memory_space<vmem>>, vector<128x128xf32>
    tpu.vector_store %arg11[%c0_53, %c0_54], %146 {strides = array<i32>} : memref<128x128xf32, #tpu.memory_space<vmem>>, vector<128x128xf32>,
    return
  }
  func.func @transform_0(%arg0: i32) -> (i32, i32) {
    %c0_i32 = arith.constant 0 : i32
    %c0_i32_0 = arith.constant 0 : i32
    return %c0_i32, %arg0 : i32, i32
  }
  func.func @transform_1(%arg0: i32) -> (i32, i32) {
    %c0_i32 = arith.constant 0 : i32
    %c0_i32_0 = arith.constant 0 : i32
    return %c0_i32, %arg0 : i32, i32
  }
  func.func @transform_2(%arg0: i32) -> (i32, i32) {
    %c0_i32 = arith.constant 0 : i32
    %c0_i32_0 = arith.constant 0 : i32
    return %c0_i32, %arg0 : i32, i32
  }
  func.func @transform_3(%arg0: i32) -> (i32, i32) {
    %c0_i32 = arith.constant 0 : i32
    %c0_i32_0 = arith.constant 0 : i32
    return %c0_i32, %arg0 : i32, i32
  }
  func.func @transform_4(%arg0: i32) -> (i32, i32) {
    %c0_i32 = arith.constant 0 : i32
    %c0_i32_0 = arith.constant 0 : i32
    return %c0_i32, %arg0 : i32, i32
  }
  func.func @transform_5(%arg0: i32) -> (i32, i32) {
    %c0_i32 = arith.constant 0 : i32
    %c0_i32_0 = arith.constant 0 : i32
    return %c0_i32, %arg0 : i32, i32
  }
  func.func @transform_6(%arg0: i32) -> (i32, i32) {
    %c0_i32 = arith.constant 0 : i32
    %c0_i32_0 = arith.constant 0 : i32
    %c0_i32_1 = arith.constant 0 : i32
    return %c0_i32, %c0_i32_0 : i32, i32
  }
  func.func @transform_7(%arg0: i32) -> (i32, i32) {
    %c0_i32 = arith.constant 0 : i32
    %c0_i32_0 = arith.constant 0 : i32
    %c0_i32_1 = arith.constant 0 : i32
    return %c0_i32, %c0_i32_0 : i32, i32
  }
  func.func @transform_8(%arg0: i32) -> (i32, i32) {
    %c0_i32 = arith.constant 0 : i32
    %c0_i32_0 = arith.constant 0 : i32
    %c0_i32_1 = arith.constant 0 : i32
    return %c0_i32, %c0_i32_0 : i32, i32
  }
  func.func @transform_9(%arg0: i32) -> (i32, i32) {
    %c0_i32 = arith.constant 0 : i32
    %c0_i32_0 = arith.constant 0 : i32
    %c0_i32_1 = arith.constant 0 : i32
    return %c0_i32, %c0_i32_0 : i32, i32
  }
  func.func @transform_10(%arg0: i32) -> (i32, i32) {
    %c0_i32 = arith.constant 0 : i32
    %c0_i32_0 = arith.constant 0 : i32
    return %c0_i32, %arg0 : i32, i32
  }
}

</mosaic_0001>

<bundles_post_ra>
// kernel: net_forward.1
= control target key start
LH: loop header
LB: loop body
LE: loop exit
PB: predicated region body
PF: predicated region fallthrough
CT: control target
= control target key end

     0   :  { %s4203_s0 = inlined_call_operand.vmem [shape: f32[128,128], index: 0, kind: input, shape index: {}]   ;;  %s4204_s1 = inlined_call_operand.vmem [shape: f32[128,128], index: 1, kind: input, shape index: {}]   ;;  %s4205_s2 = inlined_call_operand.vmem [shape: f32[128,128], index: 2, kind: input, shape index: {}]   ;;  %s4206_s3 = inlined_call_operand.vmem [shape: f32[128,128], index: 3, kind: input, shape index: {}]   ;;  %s4207_s4 = inlined_call_operand.vmem [shape: f32[128,128], index: 4, kind: input, shape index: {}]   ;;  %s4208_s5 = inlined_call_operand.vmem [shape: f32[128,128], index: 5, kind: input, shape index: {}]   ;;  %s4209_s6 = inlined_call_operand.vmem [shape: f32[128,256], index: 6, kind: input, shape index: {}]   ;;  %s4210_s7 = inlined_call_operand.vmem [shape: f32[128,1], index: 7, kind: input, shape index: {}]   ;;  %s4211_s9 = inlined_call_operand.vmem [shape: f32[128,1], index: 9, kind: input, shape index: {}]   ;;  %s4212_s8 = inlined_call_operand.vmem [shape: f32[128,128], index: 8, kind: input, shape index: {}]   ;;  %s4213_s10 = inlined_call_operand.vmem [shape: f32[128,128], index: 10, kind: output, shape index: {}]  }
   0x1   :  { %v35_v0 = vld [vmem:[%s4203_s0] sm:$0xff]  ;;  %v36_v1 = vld [vmem:[%s4203_s0 + $0x8] sm:$0xff]  ;;  %v37_v2 = vld [vmem:[%s4203_s0 + $0x10] sm:$0xff] }
   0x2   :  { %v51_v3 = vld [vmem:[%s4204_s1] sm:$0xff]  ;;  %v52_v4 = vld [vmem:[%s4204_s1 + $0x8] sm:$0xff]  ;;  %v53_v5 = vld [vmem:[%s4204_s1 + $0x10] sm:$0xff] }
   0x3   :  { %v2221_v6 = vsub.f32 %v35_v0, %v51_v3  ;;  %v2223_v7 = vsub.f32 %v36_v1, %v52_v4  ;;  %v38_v8 = vld [vmem:[%s4203_s0 + $0x18] sm:$0xff]  ;;  %v2231_v10 = vsub.f32 %v37_v2, %v53_v5  ;;  %v39_v11 = vld [vmem:[%s4203_s0 + $0x20] sm:$0xff]  ;;  %v40_v16 = vld [vmem:[%s4203_s0 + $0x28] sm:$0xff] }
   0x4   :  { %v54_v9 = vld [vmem:[%s4204_s1 + $0x18] sm:$0xff]  ;;  %v55_v12 = vld [vmem:[%s4204_s1 + $0x20] sm:$0xff]  ;;  %v56_v17 = vld [vmem:[%s4204_s1 + $0x28] sm:$0xff] }
   0x5   :  { %v2239_v13 = vsub.f32 %v38_v8, %v54_v9  ;;  %v147_v14 = vmul.f32 %v2221_v6, %v2221_v6  ;;  %v148_v15 = vmul.f32 %v2223_v7, %v2223_v7  ;;  %v2251_v18 = vsub.f32 %v39_v11, %v55_v12  ;;  %v41_v20 = vld [vmem:[%s4203_s0 + $0x30] sm:$0xff]  ;;  %v42_v25 = vld [vmem:[%s4203_s0 + $0x38] sm:$0xff]  ;;  %v43_v30 = vld [vmem:[%s4203_s0 + $0x40] sm:$0xff] }
   0x6   :  { %v149_v19 = vmul.f32 %v2231_v10, %v2231_v10  ;;  %v57_v21 = vld [vmem:[%s4204_s1 + $0x30] sm:$0xff]  ;;  %v2261_v22 = vsub.f32 %v40_v16, %v56_v17  ;;  %v58_v26 = vld [vmem:[%s4204_s1 + $0x38] sm:$0xff]  ;;  %v59_v31 = vld [vmem:[%s4204_s1 + $0x40] sm:$0xff] }
   0x7   :  { %v150_v23 = vmul.f32 %v2239_v13, %v2239_v13  ;;  %v163_v24 = vadd.f32 %v148_v15, %v147_v14  ;;  %v2271_v27 = vsub.f32 %v41_v20, %v57_v21  ;;  %v151_v28 = vmul.f32 %v2251_v18, %v2251_v18  ;;  %v44_v35 = vld [vmem:[%s4203_s0 + $0x48] sm:$0xff]  ;;  %v45_v40 = vld [vmem:[%s4203_s0 + $0x50] sm:$0xff]  ;;  %v46_v45 = vld [vmem:[%s4203_s0 + $0x58] sm:$0xff] }
   0x8   :  { %v2281_v32 = vsub.f32 %v42_v25, %v58_v26  ;;  %v152_v33 = vmul.f32 %v2261_v22, %v2261_v22  ;;  %v60_v36 = vld [vmem:[%s4204_s1 + $0x48] sm:$0xff]  ;;  %v2291_v37 = vsub.f32 %v43_v30, %v59_v31  ;;  %v61_v41 = vld [vmem:[%s4204_s1 + $0x50] sm:$0xff]  ;;  %v62_v46 = vld [vmem:[%s4204_s1 + $0x58] sm:$0xff] }
   0x9   :  { %v164_v29 = vadd.f32 %v163_v24, %v149_v19  ;;  %v153_v38 = vmul.f32 %v2271_v27, %v2271_v27  ;;  %v2301_v42 = vsub.f32 %v44_v35, %v60_v36  ;;  %v2311_v47 = vsub.f32 %v45_v40, %v61_v41  ;;  %v47_v50 = vld [vmem:[%s4203_s0 + $0x60] sm:$0xff]  ;;  %v48_v55 = vld [vmem:[%s4203_s0 + $0x68] sm:$0xff]  ;;  %v49_v60 = vld [vmem:[%s4203_s0 + $0x70] sm:$0xff] }
   0xa   :  { %v154_v43 = vmul.f32 %v2281_v32, %v2281_v32  ;;  %v155_v48 = vmul.f32 %v2291_v37, %v2291_v37  ;;  %v63_v51 = vld [vmem:[%s4204_s1 + $0x60] sm:$0xff]  ;;  %v2321_v52 = vsub.f32 %v46_v45, %v62_v46  ;;  %v64_v56 = vld [vmem:[%s4204_s1 + $0x68] sm:$0xff]  ;;  %v65_v61 = vld [vmem:[%s4204_s1 + $0x70] sm:$0xff] }
   0xb   :  { %v165_v34 = vadd.f32 %v164_v29, %v150_v23  ;;  %v156_v53 = vmul.f32 %v2301_v42, %v2301_v42  ;;  %v2331_v57 = vsub.f32 %v47_v50, %v63_v51  ;;  %v157_v58 = vmul.f32 %v2311_v47, %v2311_v47  ;;  %v50_v1 = vld [vmem:[%s4203_s0 + $0x78] sm:$0xff]  ;;  %v2366_v29 = vld [vmem:[%s4205_s2] sm:$0xff]  ;;  %v2371_v30 = vld [vmem:[%s4205_s2 + $0x8] sm:$0xff] }
   0xc   :  { %v2341_v62 = vsub.f32 %v48_v55, %v64_v56  ;;  %v158_v63 = vmul.f32 %v2321_v52, %v2321_v52  ;;  %v66_v2 = vld [vmem:[%s4204_s1 + $0x78] sm:$0xff]  ;;  %v2351_v3 = vsub.f32 %v49_v60, %v65_v61  ;;  %v2376_v31 = vld [vmem:[%s4206_s3] sm:$0xff]  ;;  %v2391_v35 = vld [vmem:[%s4206_s3 + $0x10] sm:$0xff] }
   0xd   :  { %v166_v39 = vadd.f32 %v165_v34, %v151_v28  ;;  %v159_v4 = vmul.f32 %v2331_v57, %v2331_v57  ;;  %v2355_v8 = vsub.f32 %v50_v1, %v66_v2  ;;  %v2386_v34 = vld [vmem:[%s4205_s2 + $0x10] sm:$0xff]  ;;  %v2396_v36 = vld [vmem:[%s4205_s2 + $0x18] sm:$0xff]  ;;  %v2419_v45 = vld [vmem:[%s4206_s3 + $0x20] sm:$0xff] }
   0xe   :  { %v160_v9 = vmul.f32 %v2341_v62, %v2341_v62  ;;  %v161_v12 = vmul.f32 %v2351_v3, %v2351_v3  ;;  %v204_v41 = vadd.f32 %v2391_v35, %v2386_v34  ;;  %v2467_v60 = vld [vmem:[%s4206_s3 + $0x38] sm:$0xff]  ;;  %v2478_v2 = vld [vmem:[%s4205_s2 + $0x40] sm:$0xff] }
   0xf   :  { %v167_v44 = vadd.f32 %v166_v39, %v152_v33  ;;  %v162_v15 = vmul.f32 %v2355_v8, %v2355_v8  ;;  %v2381_v33 = vld [vmem:[%s4206_s3 + $0x8] sm:$0xff]  ;;  %v202_v39 = vadd.f32 %v2376_v31, %v2366_v29 }
  0x10   :  { %v203_v40 = vadd.f32 %v2381_v33, %v2371_v30 }
  0x11   :  { %v168_v49 = vadd.f32 %v167_v44, %v153_v38  ;;  %v2401_v38 = vld [vmem:[%s4206_s3 + $0x18] sm:$0xff]  ;;  %v2414_v44 = vld [vmem:[%s4205_s2 + $0x20] sm:$0xff] }
  0x12   :  { %v205_v46 = vadd.f32 %v2401_v38, %v2396_v36  ;;  %v206_v56 = vadd.f32 %v2419_v45, %v2414_v44 }
  0x13   :  { %v169_v54 = vadd.f32 %v168_v49, %v154_v43  ;;  %v2431_v49 = vld [vmem:[%s4206_s3 + $0x28] sm:$0xff] }
  0x15   :  { %v170_v59 = vadd.f32 %v169_v54, %v155_v48  ;;  %v2426_v48 = vld [vmem:[%s4205_s2 + $0x28] sm:$0xff]  ;;  %v219_v54 = vmul.f32 0.5, %v203_v40  ;;  %v2536_v40 = vld [vmem:[%s4206_s3 + $0x58] sm:$0xff] }
  0x16   :  { %4236 = vst [vmem:[#allocation3_spill] sm:$0xff] %v2536_v40 }
  0x17   :  { %v171_v0 = vadd.f32 %v170_v59, %v156_v53  ;;  %v218_v53 = vmul.f32 0.5, %v202_v39  ;;  %v2450_v59 = vld [vmem:[%s4205_s2 + $0x30] sm:$0xff]  ;;  %v2531_v39 = vld [vmem:[%s4205_s2 + $0x58] sm:$0xff] }
  0x19   :  { %v172_v5 = vadd.f32 %v171_v0, %v157_v58  ;;  %v220_v58 = vmul.f32 0.5, %v204_v41 }
  0x1b   :  { %v173_v11 = vadd.f32 %v172_v5, %v158_v63  ;;  %v221_v63 = vmul.f32 0.5, %v205_v46 }
  0x1d   :  { %v174_v14 = vadd.f32 %v173_v11, %v159_v4  ;;  %v2483_v4 = vld [vmem:[%s4206_s3 + $0x40] sm:$0xff] }
  0x1f   :  { %v175_v16 = vadd.f32 %v174_v14, %v160_v9  ;;  %v222_v9 = vmul.f32 0.5, %v206_v56  ;;  %v2497_v14 = vld [vmem:[%s4205_s2 + $0x48] sm:$0xff]  ;;  %v2548_v56 = vld [vmem:[%s4205_s2 + $0x60] sm:$0xff] }
  0x21   :  { %v176_v17 = vadd.f32 %v175_v16, %v161_v12 }
  0x23   :  { %v177_v19 = vadd.f32 %v176_v17, %v162_v15  ;;  %v2502_v15 = vld [vmem:[%s4206_s3 + $0x48] sm:$0xff] }
  0x25   :  { %v178_v20 = vrot.slane %v177_v19, 4 }
  0x27   :  { %v179_v21 = vadd.f32 %v178_v20, %v177_v19  ;;  %v210_v20 = vadd.f32 %v2483_v4, %v2478_v2 }
  0x29   :  { %v180_v23 = vrot.slane %v179_v21, 2 }
  0x2b   :  { %v181_v24 = vadd.f32 %v180_v23, %v179_v21  ;;  %v2514_v21 = vld [vmem:[%s4205_s2 + $0x50] sm:$0xff] }
  0x2c   :  { %v2519_v23 = vld [vmem:[%s4206_s3 + $0x50] sm:$0xff] }
  0x2d   :  { %v182_v25 = vrot.slane %v181_v24, 1  ;;  %4235 = vst [vmem:[#allocation2_spill] sm:$0xff] %v2519_v23 }
  0x2f   :  { %v183_v26 = vadd.f32 %v182_v25, %v181_v24 }
  0x31   :  { %v184_v28 = vmax.f32 %v183_v26, 1e-24 }
  0x33   :  { %2123 = vrsqrt.f32 %v184_v28  ;;  %v211_v28 = vadd.f32 %v2502_v15, %v2497_v14 }
  0x3d   :  { %v2409_v43 = vpop.eup %2123 }
  0x3e   :  { %v2435_v50 = vmul.f32 %v2409_v43, %v2221_v6  ;;  %v2439_v51 = vmul.f32 %v2409_v43, %v2223_v7  ;;  %v2443_v55 = vmul.f32 %v2409_v43, %v2231_v10  ;;  %v2455_v6 = vld [vmem:[%s4206_s3 + $0x30] sm:$0xff]  ;;  %v207_v7 = vadd.f32 %v2431_v49, %v2426_v48  ;;  %v2462_v10 = vld [vmem:[%s4205_s2 + $0x38] sm:$0xff] }
  0x3f   :  { %v2471_v61 = vmul.f32 %v2409_v43, %v2239_v13  ;;  %v2487_v5 = vmul.f32 %v2409_v43, %v2251_v18  ;;  %v208_v13 = vadd.f32 %v2455_v6, %v2450_v59  ;;  %v209_v12 = vadd.f32 %v2467_v60, %v2462_v10 }
  0x40   :  { %v234_v0 = vmul.f32 %v218_v53, %v2435_v50  ;;  %v235_v1 = vmul.f32 %v219_v54, %v2439_v51  ;;  %v236_v11 = vmul.f32 %v220_v58, %v2443_v55  ;;  %v2506_v18 = vmul.f32 %v2409_v43, %v2261_v22  ;;  %v2553_v58 = vld [vmem:[%s4206_s3 + $0x60] sm:$0xff] }
  0x41   :  { %v223_v16 = vmul.f32 0.5, %v207_v7  ;;  %v237_v17 = vmul.f32 %v221_v63, %v2471_v61  ;;  %v2523_v22 = vmul.f32 %v2409_v43, %v2271_v27  ;;  %v224_v24 = vmul.f32 0.5, %v208_v13  ;;  %4237 = vst [vmem:[#allocation4_spill] sm:$0xff] %v2553_v58  ;;  %v2565_v13 = vld [vmem:[%s4205_s2 + $0x68] sm:$0xff] }
  0x42   :  { %v250_v19 = vadd.f32 %v235_v1, %v234_v0  ;;  %v238_v25 = vmul.f32 %v222_v9, %v2487_v5  ;;  %v2540_v27 = vmul.f32 %v2409_v43, %v2281_v32  ;;  %v225_v41 = vmul.f32 0.5, %v209_v12  ;;  %v2570_v9 = vld [vmem:[%s4206_s3 + $0x68] sm:$0xff] }
  0x43   :  { %v239_v46 = vmul.f32 %v223_v16, %v2506_v18  ;;  %v212_v54 = vadd.f32 %v2519_v23, %v2514_v21  ;;  %v2557_v32 = vmul.f32 %v2409_v43, %v2291_v37  ;;  %v226_v7 = vmul.f32 0.5, %v210_v20  ;;  %4238 = vst [vmem:[#allocation5_spill] sm:$0xff] %v2570_v9  ;;  %v2587_v20 = vld [vmem:[%s4206_s3 + $0x70] sm:$0xff] }
  0x44   :  { %v251_v26 = vadd.f32 %v250_v19, %v236_v11  ;;  %v240_v63 = vmul.f32 %v224_v24, %v2523_v22  ;;  %v213_v1 = vadd.f32 %v2536_v40, %v2531_v39  ;;  %v2574_v37 = vmul.f32 %v2409_v43, %v2301_v42  ;;  %v2582_v19 = vld [vmem:[%s4205_s2 + $0x70] sm:$0xff]  ;;  %4240 = vst [vmem:[#allocation7_spill] sm:$0xff] %v2587_v20 }
  0x45   :  { %v227_v11 = vmul.f32 0.5, %v211_v28  ;;  %v241_v12 = vmul.f32 %v225_v41, %v2540_v27  ;;  %v2591_v42 = vmul.f32 %v2409_v43, %v2311_v47  ;;  %v228_v24 = vmul.f32 0.5, %v212_v54  ;;  %v2599_v41 = vld [vmem:[%s4205_s2 + $0x78] sm:$0xff] }
  0x46   :  { %v252_v53 = vadd.f32 %v251_v26, %v237_v17  ;;  %4239 = vst [vmem:[#allocation6_spill] sm:$0xff] %v2574_v37  ;;  %v214_v17 = vadd.f32 %v2553_v58, %v2548_v56  ;;  %v215_v28 = vadd.f32 %v2570_v9, %v2565_v13  ;;  %4242 = vst [vmem:[#allocation9_spill] sm:$0xff] %v2599_v41 }
  0x47   :  { %4241 = vst [vmem:[#allocation8_spill] sm:$0xff] %v2591_v42  ;;  %v2608_v47 = vmul.f32 %v2409_v43, %v2321_v52  ;;  %v243_v54 = vmul.f32 %v227_v11, %v2574_v37  ;;  %v244_v9 = vmul.f32 %v228_v24, %v2591_v42  ;;  %v2622_v52 = vmul.f32 %v2409_v43, %v2341_v62 }
  0x48   :  { %v253_v0 = vadd.f32 %v252_v53, %v238_v25  ;;  %v242_v25 = vmul.f32 %v226_v7, %v2557_v32  ;;  %v229_v53 = vmul.f32 0.5, %v213_v1  ;;  %v231_v1 = vmul.f32 0.5, %v215_v28 }
  0x49   :  { %4244 = vst [vmem:[#allocation11_spill] sm:$0xff] %v2608_v47  ;;  %4246 = vst [vmem:[#allocation13_spill] sm:$0xff] %v2622_v52 }
  0x4a   :  { %v254_v16 = vadd.f32 %v253_v0, %v239_v46  ;;  %v2604_v46 = vld [vmem:[%s4206_s3 + $0x78] sm:$0xff]  ;;  %v2615_v0 = vmul.f32 %v2409_v43, %v2331_v57  ;;  %v245_v11 = vmul.f32 %v229_v53, %v2608_v47  ;;  %v247_v62 = vmul.f32 %v231_v1, %v2622_v52 }
  0x4b   :  { %4243 = vst [vmem:[#allocation10_spill] sm:$0xff] %v2604_v46  ;;  %v217_v40 = vadd.f32 %v2604_v46, %v2599_v41 }
  0x4c   :  { %v255_v26 = vadd.f32 %v254_v16, %v240_v63  ;;  %v216_v63 = vadd.f32 %v2587_v20, %v2582_v19  ;;  %4245 = vst [vmem:[#allocation12_spill] sm:$0xff] %v2615_v0  ;;  %v230_v16 = vmul.f32 0.5, %v214_v17 }
  0x4e   :  { %v256_v7 = vadd.f32 %v255_v26, %v241_v12  ;;  %v2627_v26 = vmul.f32 %v2409_v43, %v2351_v3  ;;  %v232_v57 = vmul.f32 0.5, %v216_v63  ;;  %v246_v17 = vmul.f32 %v230_v16, %v2615_v0 }
  0x50   :  { %v257_v58 = vadd.f32 %v256_v7, %v242_v25  ;;  %4247 = vst [vmem:[#allocation14_spill] sm:$0xff] %v2627_v26  ;;  %v2632_v25 = vmul.f32 %v2409_v43, %v2355_v8  ;;  %v233_v7 = vmul.f32 0.5, %v217_v40  ;;  %v248_v28 = vmul.f32 %v232_v57, %v2627_v26 }
  0x52   :  { %v258_v12 = vadd.f32 %v257_v58, %v243_v54  ;;  %4248 = vst [vmem:[#allocation15_spill] sm:$0xff] %v2632_v25  ;;  %v249_v58 = vmul.f32 %v233_v7, %v2632_v25 }
  0x54   :  { %v259_v24 = vadd.f32 %v258_v12, %v244_v9 }
  0x56   :  { %v260_v46 = vadd.f32 %v259_v24, %v245_v11 }
  0x58   :  { %v261_v53 = vadd.f32 %v260_v46, %v246_v17 }
  0x5a   :  { %v262_v54 = vadd.f32 %v261_v53, %v247_v62 }
  0x5c   :  { %v263_v3 = vadd.f32 %v262_v54, %v248_v28 }
  0x5e   :  { %v264_v20 = vadd.f32 %v263_v3, %v249_v58 }
  0x60   :  { %v265_v63 = vrot.slane %v264_v20, 4 }
  0x62   :  { %v266_v41 = vadd.f32 %v265_v63, %v264_v20 }
  0x64   :  { %v267_v16 = vrot.slane %v266_v41, 2 }
  0x66   :  { %v268_v9 = vadd.f32 %v267_v16, %v266_v41 }
  0x68   :  { %v269_v12 = vrot.slane %v268_v9, 1 }
  0x6a   :  { %v270_v23 = vadd.f32 %v269_v12, %v268_v9 }
  0x6c   :  { %v1742_v8 = vmul.f32 -0.0078125, %v270_v23 }
  0x6e   :  { %v274_v43 = vmul.f32 1.442695, %v1742_v8 }
  0x70   :  { %2125 = vpow2.f32 %v274_v43 }
  0x7a   :  { %v2126_v40 = vpop.eup %2125 }
  0x7b   :  { %v276_v1 = vadd.f32 1.0, %v2126_v40 }
  0x7d   :  { %2127 = vrcp.f32 %v276_v1 }
  0x87   :  { %v2637_v11 = vpop.eup %2127 }
  0x88   :  { %v279_v46 = vmul.f32 %v2637_v11, %v2435_v50  ;;  %v280_v57 = vmul.f32 %v2637_v11, %v2439_v51  ;;  %v281_v20 = vmul.f32 %v2637_v11, %v2443_v55  ;;  %v282_v41 = vmul.f32 %v2637_v11, %v2471_v61 }
  0x89   :  { %v283_v24 = vmul.f32 %v2637_v11, %v2487_v5  ;;  %v284_v62 = vmul.f32 %v2637_v11, %v2506_v18  ;;  %v286_v54 = vmul.f32 %v2637_v11, %v2540_v27 }
  0x8a   :  { %v2648_v23 = vsub.f32 %v2366_v29, %v279_v46  ;;  %v2651_v17 = vsub.f32 %v2371_v30, %v280_v57  ;;  %v2656_v7 = vsub.f32 %v2386_v34, %v281_v20  ;;  %v2661_v28 = vsub.f32 %v2396_v36, %v282_v41 }
  0x8b   :  { %v285_v30 = vmul.f32 %v2637_v11, %v2523_v22  ;;  %v2670_v58 = vsub.f32 %v2414_v44, %v283_v24  ;;  %v2677_v36 = vsub.f32 %v2426_v48, %v284_v62  ;;  %v2682_v16 = vadd.f32 %v279_v46, %v2376_v31 }
  0x8c   :  { %v311_v53 = vmul.f32 %v2648_v23, %v2648_v23  ;;  %v312_v29 = vmul.f32 %v2651_v17, %v2651_v17  ;;  %v313_v34 = vmul.f32 %v2656_v7, %v2656_v7  ;;  %v314_v3 = vmul.f32 %v2661_v28, %v2661_v28 }
  0x8d   :  { %v2685_v9 = vadd.f32 %v280_v57, %v2381_v33  ;;  %v287_v44 = vmul.f32 %v2637_v11, %v2557_v32  ;;  %v2690_v12 = vsub.f32 %v2450_v59, %v285_v30  ;;  %v315_v48 = vmul.f32 %v2670_v58, %v2670_v58 }
  0x8e   :  { %v327_v63 = vadd.f32 %v312_v29, %v311_v53  ;;  %v2695_v43 = vadd.f32 %v281_v20, %v2391_v35  ;;  %v288_v31 = vmul.f32 %v2637_v11, %v2574_v37  ;;  %v2700_v40 = vsub.f32 %v2462_v10, %v286_v54 }
  0x8f   :  { %v316_v33 = vmul.f32 %v2677_v36, %v2677_v36  ;;  %v2705_v59 = vadd.f32 %v282_v41, %v2401_v38  ;;  %v382_v46 = vmul.f32 %v2682_v16, %v2682_v16  ;;  %v383_v35 = vmul.f32 %v2685_v9, %v2685_v9 }
  0x90   :  { %v328_v8 = vadd.f32 %v327_v63, %v313_v34  ;;  %v289_v57 = vmul.f32 %v2637_v11, %v2591_v42  ;;  %v2714_v20 = vsub.f32 %v2478_v2, %v287_v44  ;;  %v317_v10 = vmul.f32 %v2690_v12, %v2690_v12 }
  0x91   :  { %v2719_v29 = vadd.f32 %v283_v24, %v2419_v45  ;;  %v384_v38 = vmul.f32 %v2695_v43, %v2695_v43  ;;  %v290_v41 = vmul.f32 %v2637_v11, %v2608_v47  ;;  %v2726_v34 = vsub.f32 %v2497_v14, %v288_v31 }
  0x92   :  { %v329_v1 = vadd.f32 %v328_v8, %v314_v3  ;;  %v318_v2 = vmul.f32 %v2700_v40, %v2700_v40  ;;  %v2731_v63 = vadd.f32 %v284_v62, %v2431_v49  ;;  %v385_v45 = vmul.f32 %v2705_v59, %v2705_v59 }
  0x93   :  { %v398_v24 = vadd.f32 %v383_v35, %v382_v46  ;;  %v2738_v8 = vsub.f32 %v2514_v21, %v289_v57  ;;  %v319_v14 = vmul.f32 %v2714_v20, %v2714_v20  ;;  %v2743_v47 = vadd.f32 %v285_v30, %v2455_v6 }
  0x94   :  { %v330_v53 = vadd.f32 %v329_v1, %v315_v48  ;;  %v291_v48 = vmul.f32 %v2637_v11, %v2615_v0  ;;  %v386_v49 = vmul.f32 %v2719_v29, %v2719_v29  ;;  %v2750_v46 = vsub.f32 %v2531_v39, %v290_v41 }
  0x95   :  { %v399_v62 = vadd.f32 %v398_v24, %v384_v38  ;;  %v320_v21 = vmul.f32 %v2726_v34, %v2726_v34  ;;  %v387_v6 = vmul.f32 %v2731_v63, %v2731_v63  ;;  %v321_v39 = vmul.f32 %v2738_v8, %v2738_v8 }
  0x96   :  { %v331_v3 = vadd.f32 %v330_v53, %v316_v33  ;;  %v292_v33 = vmul.f32 %v2637_v11, %v2622_v52  ;;  %v2755_v53 = vadd.f32 %v286_v54, %v2467_v60  ;;  %v2762_v38 = vsub.f32 %v2548_v56, %v291_v48 }
  0x97   :  { %v400_v30 = vadd.f32 %v399_v62, %v385_v45  ;;  %v2767_v24 = vadd.f32 %v287_v44, %v2483_v4  ;;  %v388_v60 = vmul.f32 %v2743_v47, %v2743_v47  ;;  %v322_v56 = vmul.f32 %v2750_v46, %v2750_v46 }
  0x98   :  { %v332_v1 = vadd.f32 %v331_v3, %v317_v10  ;;  %v293_v10 = vmul.f32 %v2637_v11, %v2627_v26  ;;  %v2774_v45 = vsub.f32 %v2565_v13, %v292_v33  ;;  %v2779_v62 = vadd.f32 %v288_v31, %v2502_v15  ;;  %v4249_v13 = vld [vmem:[#allocation2_spill] sm:$0xff]  ;;  %v4250_v15 = vld [vmem:[#allocation9_spill] sm:$0xff] }
  0x99   :  { %v401_v54 = vadd.f32 %v400_v30, %v386_v49  ;;  %v389_v4 = vmul.f32 %v2755_v53, %v2755_v53 }
  0x9a   :  { %v333_v35 = vadd.f32 %v332_v1, %v318_v2  ;;  %v294_v2 = vmul.f32 %v2637_v11, %v2632_v25  ;;  %v323_v11 = vmul.f32 %v2762_v38, %v2762_v38  ;;  %v4252_v25 = vld [vmem:[#allocation4_spill] sm:$0xff] }
  0x9b   :  { %v402_v44 = vadd.f32 %v401_v54, %v387_v6  ;;  %v324_v6 = vmul.f32 %v2774_v45, %v2774_v45 }
  0x9c   :  { %v334_v3 = vadd.f32 %v333_v35, %v319_v14  ;;  %v2784_v14 = vsub.f32 %v2582_v19, %v293_v10  ;;  %v2789_v35 = vadd.f32 %v289_v57, %v4249_v13  ;;  %v2794_v31 = vsub.f32 %v4250_v15, %v294_v2  ;;  %v4251_v19 = vld [vmem:[#allocation3_spill] sm:$0xff] }
  0x9d   :  { %v403_v30 = vadd.f32 %v402_v44, %v388_v60  ;;  %v2799_v54 = vadd.f32 %v290_v41, %v4251_v19  ;;  %v2806_v60 = vadd.f32 %v291_v48, %v4252_v25 }
  0x9e   :  { %v335_v1 = vadd.f32 %v334_v3, %v320_v21  ;;  %v390_v21 = vmul.f32 %v2767_v24, %v2767_v24  ;;  %v325_v57 = vmul.f32 %v2784_v14, %v2784_v14  ;;  %v392_v44 = vmul.f32 %v2789_v35, %v2789_v35 }
  0x9f   :  { %v394_v25 = vmul.f32 %v2806_v60, %v2806_v60 }
  0xa0   :  { %v336_v49 = vadd.f32 %v335_v1, %v321_v39  ;;  %v391_v39 = vmul.f32 %v2779_v62, %v2779_v62  ;;  %v404_v1 = vadd.f32 %v403_v30, %v389_v4  ;;  %v393_v4 = vmul.f32 %v2799_v54, %v2799_v54 }
  0xa2   :  { %v337_v3 = vadd.f32 %v336_v49, %v322_v56  ;;  %v405_v15 = vadd.f32 %v404_v1, %v390_v21  ;;  %v326_v56 = vmul.f32 %v2794_v31, %v2794_v31  ;;  %v4253_v49 = vld [vmem:[#allocation5_spill] sm:$0xff]  ;;  %v4255_v1 = vld [vmem:[#allocation10_spill] sm:$0xff] }
  0xa3   :  { %v2813_v19 = vadd.f32 %v292_v33, %v4253_v49  ;;  %v2823_v52 = vadd.f32 %v294_v2, %v4255_v1 }
  0xa4   :  { %v338_v13 = vadd.f32 %v337_v3, %v323_v11  ;;  %v406_v30 = vadd.f32 %v405_v15, %v391_v39  ;;  %v4254_v11 = vld [vmem:[#allocation7_spill] sm:$0xff] }
  0xa5   :  { %v2818_v3 = vadd.f32 %v293_v10, %v4254_v11  ;;  %v395_v33 = vmul.f32 %v2813_v19, %v2813_v19  ;;  %v397_v10 = vmul.f32 %v2823_v52, %v2823_v52 }
  0xa6   :  { %v339_v41 = vadd.f32 %v338_v13, %v324_v6  ;;  %v407_v48 = vadd.f32 %v406_v30, %v392_v44 }
  0xa7   :  { %v396_v39 = vmul.f32 %v2818_v3, %v2818_v3 }
  0xa8   :  { %v340_v26 = vadd.f32 %v339_v41, %v325_v57  ;;  %v408_v6 = vadd.f32 %v407_v48, %v393_v4 }
  0xaa   :  { %v341_v21 = vadd.f32 %v340_v26, %v326_v56  ;;  %v409_v57 = vadd.f32 %v408_v6, %v394_v25 }
  0xac   :  { %v342_v13 = vrot.slane %v341_v21, 4  ;;  %v410_v41 = vadd.f32 %v409_v57, %v395_v33 }
  0xae   :  { %v343_v15 = vadd.f32 %v342_v13, %v341_v21  ;;  %v411_v44 = vadd.f32 %v410_v41, %v396_v39 }
  0xb0   :  { %v344_v49 = vrot.slane %v343_v15, 2  ;;  %v412_v56 = vadd.f32 %v411_v44, %v397_v10 }
  0xb2   :  { %v345_v26 = vadd.f32 %v344_v49, %v343_v15  ;;  %v413_v30 = vrot.slane %v412_v56, 4 }
  0xb4   :  { %v346_v2 = vrot.slane %v345_v26, 1  ;;  %v414_v11 = vadd.f32 %v413_v30, %v412_v56 }
  0xb6   :  { %v347_v1 = vadd.f32 %v346_v2, %v345_v26  ;;  %v415_v0 = vrot.slane %v414_v11, 2 }
  0xb8   :  { %v416_v4 = vadd.f32 %v415_v0, %v414_v11  ;;  %v348_v48 = vmax.f32 %v347_v1, 1e-24 }
  0xba   :  { %v417_v42 = vrot.slane %v416_v4, 1  ;;  %2129 = vrsqrt.f32 %v348_v48 }
  0xbc   :  { %v418_v37 = vadd.f32 %v417_v42, %v416_v4 }
  0xbe   :  { %v419_v25 = vmax.f32 %v418_v37, 1e-24 }
  0xc0   :  { %2131 = vrsqrt.f32 %v419_v25 }
  0xc4   :  { %v2831_v21 = vpop.eup %2129 }
  0xc5   :  { %v350_v33 = vmul.f32 %v2831_v21, %v2648_v23  ;;  %v351_v13 = vmul.f32 %v2831_v21, %v2651_v17  ;;  %v352_v37 = vmul.f32 %v2831_v21, %v2656_v7  ;;  %v353_v57 = vmul.f32 %v2831_v21, %v2661_v28 }
  0xca   :  { %v2833_v6 = vpop.eup %2131 }
  0xcb   :  { %v421_v39 = vmul.f32 %v2833_v6, %v2682_v16  ;;  %v422_v0 = vmul.f32 %v2833_v6, %v2685_v9  ;;  %v423_v42 = vmul.f32 %v2833_v6, %v2695_v43  ;;  %v424_v23 = vmul.f32 %v2833_v6, %v2705_v59 }
  0xcc   :  { %v354_v16 = vmul.f32 %v2831_v21, %v2670_v58  ;;  %v425_v9 = vmul.f32 %v2833_v6, %v2719_v29  ;;  %v355_v43 = vmul.f32 %v2831_v21, %v2677_v36  ;;  %v426_v28 = vmul.f32 %v2833_v6, %v2731_v63 }
  0xcd   :  { %v2851_v15 = vsub.f32 %v350_v33, %v421_v39  ;;  %v2853_v17 = vsub.f32 %v351_v13, %v422_v0  ;;  %v2859_v7 = vsub.f32 %v352_v37, %v423_v42  ;;  %v2865_v10 = vsub.f32 %v353_v57, %v424_v23 }
  0xce   :  { %v356_v58 = vmul.f32 %v2831_v21, %v2690_v12  ;;  %v427_v29 = vmul.f32 %v2833_v6, %v2743_v47  ;;  %v2875_v49 = vsub.f32 %v354_v16, %v425_v9  ;;  %v357_v63 = vmul.f32 %v2831_v21, %v2700_v40 }
  0xcf   :  { %v453_v59 = vmul.f32 %v2851_v15, %v2851_v15  ;;  %v454_v41 = vmul.f32 %v2853_v17, %v2853_v17  ;;  %v455_v36 = vmul.f32 %v2859_v7, %v2859_v7  ;;  %v428_v44 = vmul.f32 %v2833_v6, %v2755_v53 }
  0xd0   :  { %v2883_v26 = vsub.f32 %v355_v43, %v426_v28  ;;  %v456_v56 = vmul.f32 %v2865_v10, %v2865_v10  ;;  %v358_v47 = vmul.f32 %v2831_v21, %v2714_v20  ;;  %v429_v2 = vmul.f32 %v2833_v6, %v2767_v24 }
  0xd1   :  { %v469_v12 = vadd.f32 %v454_v41, %v453_v59  ;;  %v2891_v30 = vsub.f32 %v356_v58, %v427_v29  ;;  %v457_v40 = vmul.f32 %v2875_v49, %v2875_v49  ;;  %v359_v53 = vmul.f32 %v2831_v21, %v2726_v34 }
  0xd2   :  { %v430_v1 = vmul.f32 %v2833_v6, %v2779_v62  ;;  %v2899_v4 = vsub.f32 %v357_v63, %v428_v44  ;;  %v458_v20 = vmul.f32 %v2883_v26, %v2883_v26  ;;  %v360_v24 = vmul.f32 %v2831_v21, %v2738_v8 }
  0xd3   :  { %v470_v11 = vadd.f32 %v469_v12, %v455_v36  ;;  %v431_v25 = vmul.f32 %v2833_v6, %v2789_v35  ;;  %v2907_v33 = vsub.f32 %v358_v47, %v429_v2  ;;  %v459_v34 = vmul.f32 %v2891_v30, %v2891_v30 }
  0xd4   :  { %v361_v62 = vmul.f32 %v2831_v21, %v2750_v46  ;;  %v432_v39 = vmul.f32 %v2833_v6, %v2799_v54  ;;  %v2915_v0 = vsub.f32 %v359_v53, %v430_v1  ;;  %v460_v8 = vmul.f32 %v2899_v4, %v2899_v4 }
  0xd5   :  { %v471_v48 = vadd.f32 %v470_v11, %v456_v56  ;;  %v362_v35 = vmul.f32 %v2831_v21, %v2762_v38  ;;  %v433_v42 = vmul.f32 %v2833_v6, %v2806_v60  ;;  %v2923_v57 = vsub.f32 %v360_v24, %v431_v25 }
  0xd6   :  { %v461_v46 = vmul.f32 %v2907_v33, %v2907_v33  ;;  %v363_v54 = vmul.f32 %v2831_v21, %v2774_v45  ;;  %v434_v16 = vmul.f32 %v2833_v6, %v2813_v19  ;;  %v2931_v9 = vsub.f32 %v361_v62, %v432_v39 }
  0xd7   :  { %v472_v13 = vadd.f32 %v471_v48, %v457_v40  ;;  %v462_v38 = vmul.f32 %v2915_v0, %v2915_v0  ;;  %v364_v60 = vmul.f32 %v2831_v21, %v2784_v14  ;;  %v435_v28 = vmul.f32 %v2833_v6, %v2818_v3 }
  0xd8   :  { %v2939_v59 = vsub.f32 %v362_v35, %v433_v42  ;;  %v463_v45 = vmul.f32 %v2923_v57, %v2923_v57  ;;  %v365_v19 = vmul.f32 %v2831_v21, %v2794_v31  ;;  %v436_v58 = vmul.f32 %v2833_v6, %v2823_v52 }
  0xd9   :  { %v473_v37 = vadd.f32 %v472_v13, %v458_v20  ;;  %v2947_v29 = vsub.f32 %v363_v54, %v434_v16  ;;  %v464_v14 = vmul.f32 %v2931_v9, %v2931_v9  ;;  %v2951_v63 = vsub.f32 %v364_v60, %v435_v28 }
  0xda   :  { %v465_v3 = vmul.f32 %v2939_v59, %v2939_v59  ;;  %v2955_v56 = vsub.f32 %v365_v19, %v436_v58  ;;  %v4256_v58 = vld [vmem:[#allocation6_spill] sm:$0xff] }
  0xdb   :  { %v474_v23 = vadd.f32 %v473_v37, %v459_v34  ;;  %v466_v31 = vmul.f32 %v2947_v29, %v2947_v29  ;;  %v467_v52 = vmul.f32 %v2951_v63, %v2951_v63 }
  0xdc   :  { %v468_v12 = vmul.f32 %v2955_v56, %v2955_v56 }
  0xdd   :  { %v475_v43 = vadd.f32 %v474_v23, %v460_v8 }
  0xdf   :  { %v476_v41 = vadd.f32 %v475_v43, %v461_v46 }
  0xe1   :  { %v477_v36 = vadd.f32 %v476_v41, %v462_v38 }
  0xe3   :  { %v478_v44 = vadd.f32 %v477_v36, %v463_v45 }
  0xe5   :  { %v479_v21 = vadd.f32 %v478_v44, %v464_v14  ;;  %v4257_v44 = vld [vmem:[#allocation8_spill] sm:$0xff] }
  0xe7   :  { %v480_v6 = vadd.f32 %v479_v21, %v465_v3 }
  0xe9   :  { %v481_v47 = vadd.f32 %v480_v6, %v466_v31  ;;  %v4258_v6 = vld [vmem:[#allocation11_spill] sm:$0xff] }
  0xeb   :  { %v482_v2 = vadd.f32 %v481_v47, %v467_v52 }
  0xed   :  { %v483_v40 = vadd.f32 %v482_v2, %v468_v12 }
  0xef   :  { %v484_v11 = vrot.slane %v483_v40, 4 }
  0xf1   :  { %v485_v53 = vadd.f32 %v484_v11, %v483_v40  ;;  %v4259_v11 = vld [vmem:[#allocation12_spill] sm:$0xff] }
  0xf3   :  { %v486_v1 = vrot.slane %v485_v53, 2 }
  0xf5   :  { %v487_v20 = vadd.f32 %v486_v1, %v485_v53 }
  0xf7   :  { %v488_v48 = vrot.slane %v487_v20, 1 }
  0xf9   :  { %v489_v24 = vadd.f32 %v488_v48, %v487_v20 }
  0xfb   :  { %v490_v25 = vmax.f32 %v489_v24, 1e-24  ;;  %v4260_v24 = vld [vmem:[#allocation13_spill] sm:$0xff] }
  0xfd   :  { %2133 = vrsqrt.f32 %v490_v25 }
 0x107   :  { %v2134_v34 = vpop.eup %2133 }
 0x108   :  { %v492_v13 = vmul.f32 %v2134_v34, %v2851_v15  ;;  %v493_v62 = vmul.f32 %v2134_v34, %v2853_v17  ;;  %v494_v39 = vmul.f32 %v2134_v34, %v2859_v7  ;;  %v495_v8 = vmul.f32 %v2134_v34, %v2865_v10 }
 0x109   :  { %v496_v42 = vmul.f32 %v2134_v34, %v2875_v49  ;;  %v497_v23 = vmul.f32 %v2134_v34, %v2883_v26  ;;  %v498_v17 = vmul.f32 %v2134_v34, %v2891_v30  ;;  %v500_v26 = vmul.f32 %v2134_v34, %v2907_v33 }
 0x10a   :  { %v508_v37 = vadd.f32 %v492_v13, %v2435_v50  ;;  %v509_v35 = vadd.f32 %v493_v62, %v2439_v51  ;;  %v510_v46 = vadd.f32 %v494_v39, %v2443_v55  ;;  %v511_v54 = vadd.f32 %v495_v8, %v2471_v61  ;;  %v4261_v8 = vld [vmem:[#allocation14_spill] sm:$0xff] }
 0x10b   :  { %v512_v7 = vadd.f32 %v496_v42, %v2487_v5  ;;  %v499_v50 = vmul.f32 %v2134_v34, %v2899_v4  ;;  %v513_v51 = vadd.f32 %v497_v23, %v2506_v18  ;;  %v514_v30 = vadd.f32 %v498_v17, %v2523_v22 }
 0x10c   :  { %v2973_v16 = vmul.f32 0.5, %v508_v37  ;;  %v2975_v15 = vmul.f32 0.5, %v509_v35  ;;  %v2979_v10 = vmul.f32 0.5, %v510_v46  ;;  %v2983_v49 = vmul.f32 0.5, %v511_v54  ;;  %v4262_v46 = vld [vmem:[#allocation15_spill] sm:$0xff] }
 0x10d   :  { %v2991_v38 = vmul.f32 0.5, %v512_v7  ;;  %v501_v4 = vmul.f32 %v2134_v34, %v2915_v0  ;;  %v515_v18 = vadd.f32 %v499_v50, %v2540_v27  ;;  %v2997_v43 = vmul.f32 0.5, %v513_v51 }
 0x10e   :  { %v540_v55 = vmul.f32 %v2973_v16, %v2973_v16  ;;  %v541_v61 = vmul.f32 %v2975_v15, %v2975_v15  ;;  %v542_v5 = vmul.f32 %v2979_v10, %v2979_v10  ;;  %v543_v60 = vmul.f32 %v2983_v49, %v2983_v49 }
 0x10f   :  { %v502_v45 = vmul.f32 %v2134_v34, %v2923_v57  ;;  %v516_v33 = vadd.f32 %v500_v26, %v2557_v32  ;;  %v3003_v22 = vmul.f32 0.5, %v514_v30  ;;  %v544_v41 = vmul.f32 %v2991_v38, %v2991_v38 }
 0x110   :  { %v556_v28 = vadd.f32 %v541_v61, %v540_v55  ;;  %v503_v0 = vmul.f32 %v2134_v34, %v2931_v9  ;;  %v517_v27 = vadd.f32 %v501_v4, %v4256_v58  ;;  %v3009_v14 = vmul.f32 0.5, %v515_v18 }
 0x111   :  { %v545_v36 = vmul.f32 %v2997_v43, %v2997_v43  ;;  %v504_v57 = vmul.f32 %v2134_v34, %v2939_v59  ;;  %v518_v32 = vadd.f32 %v502_v45, %v4257_v44  ;;  %v3015_v31 = vmul.f32 0.5, %v516_v33  ;;  %v3082_v44 = vld [vmem:[%s4207_s4 + $0x10] sm:$0xff] }
 0x112   :  { %v557_v19 = vadd.f32 %v556_v28, %v542_v5  ;;  %v546_v21 = vmul.f32 %v3003_v22, %v3003_v22  ;;  %v505_v9 = vmul.f32 %v2134_v34, %v2947_v29  ;;  %v519_v12 = vadd.f32 %v503_v0, %v4258_v6 }
 0x113   :  { %v3021_v47 = vmul.f32 0.5, %v517_v27  ;;  %v547_v2 = vmul.f32 %v3009_v14, %v3009_v14  ;;  %v506_v59 = vmul.f32 %v2134_v34, %v2951_v63  ;;  %v520_v53 = vadd.f32 %v504_v57, %v4259_v11  ;;  %v3062_v27 = vld [vmem:[%s4207_s4] sm:$0xff]  ;;  %v3077_v57 = vld [vmem:[%s4208_s5 + $0x8] sm:$0xff] }
 0x114   :  { %v558_v3 = vadd.f32 %v557_v19, %v543_v60  ;;  %v3027_v1 = vmul.f32 0.5, %v518_v32  ;;  %v548_v20 = vmul.f32 %v3015_v31, %v3015_v31  ;;  %v507_v29 = vmul.f32 %v2134_v34, %v2955_v56  ;;  %v3087_v32 = vld [vmem:[%s4208_s5 + $0x10] sm:$0xff] }
 0x115   :  { %v521_v25 = vadd.f32 %v505_v9, %v4260_v24  ;;  %v3033_v13 = vmul.f32 0.5, %v519_v12  ;;  %v549_v62 = vmul.f32 %v3021_v47, %v3021_v47  ;;  %v522_v63 = vadd.f32 %v506_v59, %v4261_v8  ;;  %v3115_v59 = vld [vmem:[%s4208_s5 + $0x20] sm:$0xff] }
 0x116   :  { %v559_v52 = vadd.f32 %v558_v3, %v544_v41  ;;  %v3038_v37 = vmul.f32 0.5, %v520_v53  ;;  %v550_v35 = vmul.f32 %v3027_v1, %v3027_v1  ;;  %v523_v23 = vadd.f32 %v507_v29, %v4262_v46  ;;  %v3072_v3 = vld [vmem:[%s4208_s5] sm:$0xff]  ;;  %v3122_v53 = vld [vmem:[%s4207_s4 + $0x28] sm:$0xff] }
 0x117   :  { %v3043_v54 = vmul.f32 0.5, %v521_v25  ;;  %v551_v56 = vmul.f32 %v3033_v13, %v3033_v13  ;;  %v3047_v17 = vmul.f32 0.5, %v522_v63  ;;  %v595_v9 = vadd.f32 %v3072_v3, %v3062_v27  ;;  %v3146_v63 = vld [vmem:[%s4207_s4 + $0x30] sm:$0xff] }
 0x118   :  { %v560_v40 = vadd.f32 %v559_v52, %v545_v36  ;;  %v552_v7 = vmul.f32 %v3038_v37, %v3038_v37  ;;  %v3051_v51 = vmul.f32 0.5, %v523_v23  ;;  %v3067_v36 = vld [vmem:[%s4207_s4 + $0x8] sm:$0xff]  ;;  %v3097_v52 = vld [vmem:[%s4208_s5 + $0x18] sm:$0xff]  ;;  %v597_v12 = vadd.f32 %v3087_v32, %v3082_v44 }
 0x119   :  { %v553_v55 = vmul.f32 %v3043_v54, %v3043_v54  ;;  %v554_v26 = vmul.f32 %v3047_v17, %v3047_v17  ;;  %v596_v6 = vadd.f32 %v3077_v57, %v3067_v36  ;;  %v611_v24 = vmul.f32 0.5, %v595_v9  ;;  %v3227_v9 = vld [vmem:[%s4207_s4 + $0x58] sm:$0xff] }
 0x11a   :  { %v561_v48 = vadd.f32 %v560_v40, %v546_v21  ;;  %v555_v5 = vmul.f32 %v3051_v51, %v3051_v51  ;;  %v3092_v21 = vld [vmem:[%s4207_s4 + $0x18] sm:$0xff]  ;;  %v3110_v40 = vld [vmem:[%s4207_s4 + $0x20] sm:$0xff]  ;;  %v613_v8 = vmul.f32 0.5, %v597_v12 }
 0x11b   :  { %v598_v11 = vadd.f32 %v3097_v52, %v3092_v21  ;;  %v612_v25 = vmul.f32 0.5, %v596_v6  ;;  %v3232_v6 = vld [vmem:[%s4208_s5 + $0x58] sm:$0xff] }
 0x11c   :  { %v562_v39 = vadd.f32 %v561_v48, %v547_v2  ;;  %4264 = vst [vmem:[#allocation9_spill] sm:$0xff] %v3232_v6 }
 0x11d   :  { %v614_v46 = vmul.f32 0.5, %v598_v11 }
 0x11e   :  { %v563_v42 = vadd.f32 %v562_v39, %v548_v20  ;;  %v3127_v20 = vld [vmem:[%s4208_s5 + $0x28] sm:$0xff]  ;;  %v599_v39 = vadd.f32 %v3115_v59, %v3110_v40 }
 0x120   :  { %v564_v34 = vadd.f32 %v563_v42, %v549_v62 }
 0x122   :  { %v565_v50 = vadd.f32 %v564_v34, %v550_v35  ;;  %v3163_v35 = vld [vmem:[%s4208_s5 + $0x38] sm:$0xff]  ;;  %v3174_v34 = vld [vmem:[%s4207_s4 + $0x40] sm:$0xff] }
 0x124   :  { %v566_v61 = vadd.f32 %v565_v50, %v551_v56 }
 0x126   :  { %v567_v30 = vadd.f32 %v566_v61, %v552_v7  ;;  %v3179_v7 = vld [vmem:[%s4208_s5 + $0x40] sm:$0xff] }
 0x128   :  { %v568_v4 = vadd.f32 %v567_v30, %v553_v55  ;;  %v615_v55 = vmul.f32 0.5, %v599_v39  ;;  %v3193_v30 = vld [vmem:[%s4207_s4 + $0x48] sm:$0xff]  ;;  %v3244_v39 = vld [vmem:[%s4207_s4 + $0x60] sm:$0xff] }
 0x12a   :  { %v569_v18 = vadd.f32 %v568_v4, %v554_v26 }
 0x12c   :  { %v570_v60 = vadd.f32 %v569_v18, %v555_v5  ;;  %v3198_v5 = vld [vmem:[%s4208_s5 + $0x48] sm:$0xff] }
 0x12e   :  { %v571_v28 = vrot.slane %v570_v60, 4 }
 0x130   :  { %v572_v45 = vadd.f32 %v571_v28, %v570_v60  ;;  %v603_v28 = vadd.f32 %v3179_v7, %v3174_v34 }
 0x132   :  { %v573_v33 = vrot.slane %v572_v45, 2 }
 0x134   :  { %v574_v41 = vadd.f32 %v573_v33, %v572_v45  ;;  %v3210_v45 = vld [vmem:[%s4207_s4 + $0x50] sm:$0xff] }
 0x135   :  { %v3215_v33 = vld [vmem:[%s4208_s5 + $0x50] sm:$0xff] }
 0x136   :  { %v575_v19 = vrot.slane %v574_v41, 1  ;;  %4263 = vst [vmem:[#allocation2_spill] sm:$0xff] %v3215_v33 }
 0x138   :  { %v576_v0 = vadd.f32 %v575_v19, %v574_v41 }
 0x13a   :  { %v577_v58 = vmax.f32 %v576_v0, 1e-24 }
 0x13c   :  { %2135 = vrsqrt.f32 %v577_v58  ;;  %v604_v58 = vadd.f32 %v3198_v5, %v3193_v30 }
 0x146   :  { %v3105_v2 = vpop.eup %2135 }
 0x147   :  { %v3131_v48 = vmul.f32 %v3105_v2, %v2973_v16  ;;  %v3135_v29 = vmul.f32 %v3105_v2, %v2975_v15  ;;  %v3139_v62 = vmul.f32 %v3105_v2, %v2979_v10  ;;  %v3151_v16 = vld [vmem:[%s4208_s5 + $0x30] sm:$0xff]  ;;  %v600_v15 = vadd.f32 %v3127_v20, %v3122_v53  ;;  %v3158_v10 = vld [vmem:[%s4207_s4 + $0x38] sm:$0xff] }
 0x148   :  { %v3167_v42 = vmul.f32 %v3105_v2, %v2983_v49  ;;  %v3183_v50 = vmul.f32 %v3105_v2, %v2991_v38  ;;  %v601_v49 = vadd.f32 %v3151_v16, %v3146_v63  ;;  %v602_v26 = vadd.f32 %v3163_v35, %v3158_v10 }
 0x149   :  { %v627_v23 = vmul.f32 %v611_v24, %v3131_v48  ;;  %v628_v56 = vmul.f32 %v612_v25, %v3135_v29  ;;  %v629_v61 = vmul.f32 %v613_v8, %v3139_v62  ;;  %v3202_v38 = vmul.f32 %v3105_v2, %v2997_v43  ;;  %v3249_v8 = vld [vmem:[%s4208_s5 + $0x60] sm:$0xff] }
 0x14a   :  { %v616_v4 = vmul.f32 0.5, %v600_v15  ;;  %v630_v18 = vmul.f32 %v614_v46, %v3167_v42  ;;  %v3219_v43 = vmul.f32 %v3105_v2, %v3003_v22  ;;  %v617_v41 = vmul.f32 0.5, %v601_v49  ;;  %4265 = vst [vmem:[#allocation3_spill] sm:$0xff] %v3249_v8  ;;  %v3261_v49 = vld [vmem:[%s4207_s4 + $0x68] sm:$0xff] }
 0x14b   :  { %v643_v60 = vadd.f32 %v628_v56, %v627_v23  ;;  %v631_v19 = vmul.f32 %v615_v55, %v3183_v50  ;;  %v3236_v22 = vmul.f32 %v3105_v2, %v3009_v14  ;;  %v618_v12 = vmul.f32 0.5, %v602_v26  ;;  %v3266_v55 = vld [vmem:[%s4208_s5 + $0x68] sm:$0xff] }
 0x14c   :  { %v632_v11 = vmul.f32 %v616_v4, %v3202_v38  ;;  %v605_v25 = vadd.f32 %v3215_v33, %v3210_v45  ;;  %v3253_v14 = vmul.f32 %v3105_v2, %v3015_v31  ;;  %v619_v15 = vmul.f32 0.5, %v603_v28  ;;  %4266 = vst [vmem:[#allocation4_spill] sm:$0xff] %v3266_v55  ;;  %v3283_v28 = vld [vmem:[%s4208_s5 + $0x70] sm:$0xff] }
 0x14d   :  { %v644_v0 = vadd.f32 %v643_v60, %v629_v61  ;;  %v633_v46 = vmul.f32 %v617_v41, %v3219_v43  ;;  %v606_v56 = vadd.f32 %v3232_v6, %v3227_v9  ;;  %v3270_v31 = vmul.f32 %v3105_v2, %v3021_v47  ;;  %v3278_v60 = vld [vmem:[%s4207_s4 + $0x70] sm:$0xff]  ;;  %4267 = vst [vmem:[#allocation5_spill] sm:$0xff] %v3283_v28 }
 0x14e   :  { %v620_v61 = vmul.f32 0.5, %v604_v58  ;;  %v634_v26 = vmul.f32 %v618_v12, %v3236_v22  ;;  %v3287_v47 = vmul.f32 %v3105_v2, %v3027_v1  ;;  %v621_v41 = vmul.f32 0.5, %v605_v25  ;;  %v3295_v12 = vld [vmem:[%s4207_s4 + $0x78] sm:$0xff] }
 0x14f   :  { %v645_v24 = vadd.f32 %v644_v0, %v630_v18  ;;  %v607_v18 = vadd.f32 %v3249_v8, %v3244_v39  ;;  %v608_v58 = vadd.f32 %v3266_v55, %v3261_v49  ;;  %4268 = vst [vmem:[#allocation7_spill] sm:$0xff] %v3295_v12  ;;  %v3304_v1 = vmul.f32 %v3105_v2, %v3033_v13 }
 0x150   :  { %v636_v25 = vmul.f32 %v620_v61, %v3270_v31  ;;  %v637_v55 = vmul.f32 %v621_v41, %v3287_v47  ;;  %v3318_v13 = vmul.f32 %v3105_v2, %v3043_v54 }
 0x151   :  { %v646_v23 = vadd.f32 %v645_v24, %v631_v19  ;;  %v635_v19 = vmul.f32 %v619_v15, %v3253_v14  ;;  %v622_v24 = vmul.f32 0.5, %v606_v56  ;;  %v624_v56 = vmul.f32 0.5, %v608_v58 }
 0x153   :  { %v647_v4 = vadd.f32 %v646_v23, %v632_v11  ;;  %v3300_v11 = vld [vmem:[%s4208_s5 + $0x78] sm:$0xff]  ;;  %v3311_v23 = vmul.f32 %v3105_v2, %v3038_v37  ;;  %v638_v61 = vmul.f32 %v622_v24, %v3304_v1  ;;  %v640_v54 = vmul.f32 %v624_v56, %v3318_v13 }
 0x154   :  { %4269 = vst [vmem:[#allocation10_spill] sm:$0xff] %v3300_v11  ;;  %v610_v6 = vadd.f32 %v3300_v11, %v3295_v12 }
 0x155   :  { %v648_v0 = vadd.f32 %v647_v4, %v633_v46  ;;  %v609_v46 = vadd.f32 %v3283_v28, %v3278_v60  ;;  %v623_v4 = vmul.f32 0.5, %v607_v18 }
 0x157   :  { %v649_v15 = vadd.f32 %v648_v0, %v634_v26  ;;  %v3323_v0 = vmul.f32 %v3105_v2, %v3047_v17  ;;  %v625_v37 = vmul.f32 0.5, %v609_v46  ;;  %v639_v18 = vmul.f32 %v623_v4, %v3311_v23 }
 0x159   :  { %v650_v8 = vadd.f32 %v649_v15, %v635_v19  ;;  %v3328_v19 = vmul.f32 %v3105_v2, %v3051_v51  ;;  %v626_v15 = vmul.f32 0.5, %v610_v6  ;;  %v641_v58 = vmul.f32 %v625_v37, %v3323_v0 }
 0x15b   :  { %v651_v26 = vadd.f32 %v650_v8, %v636_v25  ;;  %v642_v8 = vmul.f32 %v626_v15, %v3328_v19 }
 0x15d   :  { %v652_v41 = vadd.f32 %v651_v26, %v637_v55 }
 0x15f   :  { %v653_v11 = vadd.f32 %v652_v41, %v638_v61 }
 0x161   :  { %v654_v24 = vadd.f32 %v653_v11, %v639_v18 }
 0x163   :  { %v655_v25 = vadd.f32 %v654_v24, %v640_v54 }
 0x165   :  { %v656_v17 = vadd.f32 %v655_v25, %v641_v58 }
 0x167   :  { %v657_v28 = vadd.f32 %v656_v17, %v642_v8 }
 0x169   :  { %v658_v46 = vrot.slane %v657_v28, 4 }
 0x16b   :  { %v659_v12 = vadd.f32 %v658_v46, %v657_v28 }
 0x16d   :  { %v660_v4 = vrot.slane %v659_v12, 2 }
 0x16f   :  { %v661_v55 = vadd.f32 %v660_v4, %v659_v12 }
 0x171   :  { %v662_v26 = vrot.slane %v661_v55, 1 }
 0x173   :  { %v663_v33 = vadd.f32 %v662_v26, %v661_v55 }
 0x175   :  { %v1743_v51 = vmul.f32 -0.0078125, %v663_v33 }
 0x177   :  { %v666_v2 = vmul.f32 1.442695, %v1743_v51 }
 0x179   :  { %2137 = vpow2.f32 %v666_v2 }
 0x183   :  { %v2138_v6 = vpop.eup %2137 }
 0x184   :  { %v668_v56 = vadd.f32 1.0, %v2138_v6 }
 0x186   :  { %2139 = vrcp.f32 %v668_v56 }
 0x190   :  { %v3333_v61 = vpop.eup %2139 }
 0x191   :  { %v671_v11 = vmul.f32 %v3333_v61, %v3131_v48  ;;  %v672_v37 = vmul.f32 %v3333_v61, %v3135_v29  ;;  %v673_v28 = vmul.f32 %v3333_v61, %v3139_v62  ;;  %v674_v12 = vmul.f32 %v3333_v61, %v3167_v42 }
 0x192   :  { %v675_v41 = vmul.f32 %v3333_v61, %v3183_v50  ;;  %v676_v29 = vmul.f32 %v3333_v61, %v3202_v38  ;;  %v678_v38 = vmul.f32 %v3333_v61, %v3236_v22  ;;  %v681_v46 = vmul.f32 %v3333_v61, %v3287_v47 }
 0x193   :  { %v3344_v33 = vsub.f32 %v3062_v27, %v671_v11  ;;  %v3347_v18 = vsub.f32 %v3067_v36, %v672_v37  ;;  %v3352_v48 = vsub.f32 %v3082_v44, %v673_v28  ;;  %v3357_v62 = vsub.f32 %v3092_v21, %v674_v12 }
 0x194   :  { %v677_v36 = vmul.f32 %v3333_v61, %v3219_v43  ;;  %v3366_v50 = vsub.f32 %v3110_v40, %v675_v41  ;;  %v3373_v21 = vsub.f32 %v3122_v53, %v676_v29  ;;  %v3378_v58 = vadd.f32 %v671_v11, %v3072_v3 }
 0x195   :  { %v703_v42 = vmul.f32 %v3344_v33, %v3344_v33  ;;  %v704_v27 = vmul.f32 %v3347_v18, %v3347_v18  ;;  %v705_v44 = vmul.f32 %v3352_v48, %v3352_v48  ;;  %v706_v15 = vmul.f32 %v3357_v62, %v3357_v62 }
 0x196   :  { %v3381_v43 = vadd.f32 %v672_v37, %v3077_v57  ;;  %v679_v40 = vmul.f32 %v3333_v61, %v3253_v14  ;;  %v3386_v24 = vsub.f32 %v3146_v63, %v677_v36  ;;  %v707_v53 = vmul.f32 %v3366_v50, %v3366_v50 }
 0x197   :  { %v719_v54 = vadd.f32 %v704_v27, %v703_v42  ;;  %v3391_v8 = vadd.f32 %v673_v28, %v3087_v32  ;;  %v680_v3 = vmul.f32 %v3333_v61, %v3270_v31  ;;  %v3396_v25 = vsub.f32 %v3158_v10, %v678_v38 }
 0x198   :  { %v708_v57 = vmul.f32 %v3373_v21, %v3373_v21  ;;  %v3401_v63 = vadd.f32 %v674_v12, %v3097_v52  ;;  %v774_v17 = vmul.f32 %v3378_v58, %v3378_v58  ;;  %v775_v32 = vmul.f32 %v3381_v43, %v3381_v43 }
 0x199   :  { %v720_v22 = vadd.f32 %v719_v54, %v705_v44  ;;  %v3410_v31 = vsub.f32 %v3174_v34, %v679_v40  ;;  %v709_v10 = vmul.f32 %v3386_v24, %v3386_v24  ;;  %v3415_v55 = vadd.f32 %v675_v41, %v3115_v59 }
 0x19a   :  { %v776_v52 = vmul.f32 %v3391_v8, %v3391_v8  ;;  %v682_v26 = vmul.f32 %v3333_v61, %v3304_v1  ;;  %v3422_v51 = vsub.f32 %v3193_v30, %v680_v3  ;;  %v710_v34 = vmul.f32 %v3396_v25, %v3396_v25 }
 0x19b   :  { %v721_v14 = vadd.f32 %v720_v22, %v706_v15  ;;  %v3427_v2 = vadd.f32 %v676_v29, %v3127_v20  ;;  %v777_v59 = vmul.f32 %v3401_v63, %v3401_v63  ;;  %v790_v6 = vadd.f32 %v775_v32, %v774_v17 }
 0x19c   :  { %v683_v56 = vmul.f32 %v3333_v61, %v3311_v23  ;;  %v3434_v11 = vsub.f32 %v3210_v45, %v681_v46  ;;  %v711_v30 = vmul.f32 %v3410_v31, %v3410_v31  ;;  %v3439_v37 = vadd.f32 %v677_v36, %v3151_v16 }
 0x19d   :  { %v722_v4 = vadd.f32 %v721_v14, %v707_v53  ;;  %v778_v20 = vmul.f32 %v3415_v55, %v3415_v55  ;;  %v791_v28 = vadd.f32 %v790_v6, %v776_v52  ;;  %v684_v12 = vmul.f32 %v3333_v61, %v3318_v13 }
 0x19e   :  { %v3446_v41 = vsub.f32 %v3227_v9, %v682_v26  ;;  %v712_v45 = vmul.f32 %v3422_v51, %v3422_v51  ;;  %v3451_v29 = vadd.f32 %v678_v38, %v3163_v35  ;;  %v779_v16 = vmul.f32 %v3427_v2, %v3427_v2 }
 0x19f   :  { %v723_v47 = vadd.f32 %v722_v4, %v708_v57  ;;  %v792_v42 = vadd.f32 %v791_v28, %v777_v59  ;;  %v685_v27 = vmul.f32 %v3333_v61, %v3323_v0  ;;  %v3458_v36 = vsub.f32 %v3244_v39, %v683_v56  ;;  %v4273_v59 = vld [vmem:[#allocation3_spill] sm:$0xff]  ;;  %v4274_v28 = vld [vmem:[#allocation4_spill] sm:$0xff] }
 0x1a0   :  { %v713_v9 = vmul.f32 %v3434_v11, %v3434_v11  ;;  %v3463_v44 = vadd.f32 %v679_v40, %v3179_v7  ;;  %v780_v35 = vmul.f32 %v3439_v37, %v3439_v37  ;;  %v686_v15 = vmul.f32 %v3333_v61, %v3328_v19 }
 0x1a1   :  { %v724_v1 = vadd.f32 %v723_v47, %v709_v10  ;;  %v793_v38 = vadd.f32 %v792_v42, %v778_v20  ;;  %v3470_v54 = vsub.f32 %v3261_v49, %v684_v12  ;;  %v714_v39 = vmul.f32 %v3446_v41, %v3446_v41  ;;  %v4270_v49 = vld [vmem:[#allocation2_spill] sm:$0xff] }
 0x1a2   :  { %v3475_v53 = vadd.f32 %v680_v3, %v3198_v5  ;;  %v781_v7 = vmul.f32 %v3451_v29, %v3451_v29  ;;  %v3480_v22 = vsub.f32 %v3278_v60, %v685_v27  ;;  %v715_v19 = vmul.f32 %v3458_v36, %v3458_v36  ;;  %v4271_v5 = vld [vmem:[#allocation7_spill] sm:$0xff]  ;;  %v4272_v60 = vld [vmem:[#allocation9_spill] sm:$0xff] }
 0x1a3   :  { %v725_v23 = vadd.f32 %v724_v1, %v710_v34  ;;  %v794_v40 = vadd.f32 %v793_v38, %v779_v16  ;;  %v3485_v57 = vadd.f32 %v681_v46, %v4270_v49  ;;  %v782_v14 = vmul.f32 %v3463_v44, %v3463_v44 }
 0x1a4   :  { %v3490_v3 = vsub.f32 %v4271_v5, %v686_v15  ;;  %v716_v32 = vmul.f32 %v3470_v54, %v3470_v54  ;;  %v3495_v4 = vadd.f32 %v682_v26, %v4272_v60  ;;  %v783_v52 = vmul.f32 %v3475_v53, %v3475_v53 }
 0x1a5   :  { %v726_v13 = vadd.f32 %v725_v23, %v711_v30  ;;  %v795_v17 = vadd.f32 %v794_v40, %v780_v35  ;;  %v717_v46 = vmul.f32 %v3480_v22, %v3480_v22  ;;  %v3502_v6 = vadd.f32 %v683_v56, %v4273_v59 }
 0x1a6   :  { %v784_v30 = vmul.f32 %v3485_v57, %v3485_v57  ;;  %v718_v20 = vmul.f32 %v3490_v3, %v3490_v3  ;;  %v785_v23 = vmul.f32 %v3495_v4, %v3495_v4 }
 0x1a7   :  { %v727_v0 = vadd.f32 %v726_v13, %v712_v45  ;;  %v796_v34 = vadd.f32 %v795_v17, %v781_v7  ;;  %v3509_v45 = vadd.f32 %v684_v12, %v4274_v28  ;;  %v786_v56 = vmul.f32 %v3502_v6, %v3502_v6 }
 0x1a9   :  { %v728_v61 = vadd.f32 %v727_v0, %v713_v9  ;;  %v797_v1 = vadd.f32 %v796_v34, %v782_v14  ;;  %v4275_v9 = vld [vmem:[#allocation5_spill] sm:$0xff]  ;;  %v787_v12 = vmul.f32 %v3509_v45, %v3509_v45 }
 0x1aa   :  { %v3514_v13 = vadd.f32 %v685_v27, %v4275_v9 }
 0x1ab   :  { %v729_v10 = vadd.f32 %v728_v61, %v714_v39  ;;  %v798_v16 = vadd.f32 %v797_v1, %v783_v52  ;;  %v4276_v39 = vld [vmem:[#allocation10_spill] sm:$0xff] }
 0x1ac   :  { %v3519_v0 = vadd.f32 %v686_v15, %v4276_v39 }
 0x1ad   :  { %v730_v47 = vadd.f32 %v729_v10, %v715_v19  ;;  %v799_v35 = vadd.f32 %v798_v16, %v784_v30  ;;  %v788_v19 = vmul.f32 %v3514_v13, %v3514_v13 }
 0x1ae   :  { %v789_v27 = vmul.f32 %v3519_v0, %v3519_v0 }
 0x1af   :  { %v731_v26 = vadd.f32 %v730_v47, %v716_v32  ;;  %v800_v7 = vadd.f32 %v799_v35, %v785_v23 }
 0x1b1   :  { %v732_v42 = vadd.f32 %v731_v26, %v717_v46  ;;  %v801_v61 = vadd.f32 %v800_v7, %v786_v56 }
 0x1b3   :  { %v733_v38 = vadd.f32 %v732_v42, %v718_v20  ;;  %v802_v14 = vadd.f32 %v801_v61, %v787_v12 }
 0x1b5   :  { %v734_v40 = vrot.slane %v733_v38, 4  ;;  %v803_v5 = vadd.f32 %v802_v14, %v788_v19 }
 0x1b7   :  { %v735_v49 = vadd.f32 %v734_v40, %v733_v38  ;;  %v804_v10 = vadd.f32 %v803_v5, %v789_v27 }
 0x1b9   :  { %v736_v17 = vrot.slane %v735_v49, 2  ;;  %v805_v60 = vrot.slane %v804_v10, 4 }
 0x1bb   :  { %v737_v32 = vadd.f32 %v736_v17, %v735_v49  ;;  %v806_v34 = vadd.f32 %v805_v60, %v804_v10 }
 0x1bd   :  { %v738_v15 = vrot.slane %v737_v32, 1  ;;  %v807_v47 = vrot.slane %v806_v34, 2 }
 0x1bf   :  { %v739_v52 = vadd.f32 %v738_v15, %v737_v32  ;;  %v808_v59 = vadd.f32 %v807_v47, %v806_v34 }
 0x1c1   :  { %v740_v46 = vmax.f32 %v739_v52, 1e-24  ;;  %v809_v30 = vrot.slane %v808_v59, 1 }
 0x1c3   :  { %2141 = vrsqrt.f32 %v740_v46  ;;  %v810_v1 = vadd.f32 %v809_v30, %v808_v59 }
 0x1c5   :  { %v811_v20 = vmax.f32 %v810_v1, 1e-24 }
 0x1c7   :  { %2143 = vrsqrt.f32 %v811_v20 }
 0x1cd   :  { %v2142_v26 = vpop.eup %2141 }
 0x1ce   :  { %v3528_v28 = vmul.f32 %v2142_v26, %v3344_v33  ;;  %v3531_v23 = vmul.f32 %v2142_v26, %v3347_v18  ;;  %v3534_v16 = vmul.f32 %v2142_v26, %v3352_v48  ;;  %v3539_v9 = vmul.f32 %v2142_v26, %v3357_v62 }
 0x1cf   :  { %v3543_v38 = vmul.f32 %v2142_v26, %v3366_v50  ;;  %v3553_v39 = vmul.f32 %v2142_v26, %v3373_v21  ;;  %v3559_v12 = vmul.f32 %v2142_v26, %v3386_v24  ;;  %v3568_v7 = vmul.f32 %v2142_v26, %v3396_v25 }
 0x1d0   :  { %v829_v42 = vadd.f32 %v3531_v23, %v3528_v28  ;;  %v3576_v24 = vmul.f32 %v2142_v26, %v3410_v31  ;;  %v3584_v25 = vmul.f32 %v2142_v26, %v3422_v51  ;;  %v3592_v31 = vmul.f32 %v2142_v26, %v3434_v11 }
 0x1d1   :  { %v2144_v35 = vpop.eup %2143  ;;  %v3600_v51 = vmul.f32 %v2142_v26, %v3446_v41  ;;  %v3608_v11 = vmul.f32 %v2142_v26, %v3458_v36  ;;  %v3616_v41 = vmul.f32 %v2142_v26, %v3470_v54  ;;  %v3624_v36 = vmul.f32 %v2142_v26, %v3480_v22 }
 0x1d2   :  { %v830_v56 = vadd.f32 %v829_v42, %v3534_v16  ;;  %v3546_v33 = vmul.f32 %v2144_v35, %v3378_v58  ;;  %v3549_v18 = vmul.f32 %v2144_v35, %v3381_v43  ;;  %v3556_v62 = vmul.f32 %v2144_v35, %v3391_v8 }
 0x1d3   :  { %v3562_v50 = vmul.f32 %v2144_v35, %v3401_v63  ;;  %v3571_v21 = vmul.f32 %v2144_v35, %v3415_v55  ;;  %v3579_v63 = vmul.f32 %v2144_v35, %v3427_v2  ;;  %v3587_v55 = vmul.f32 %v2144_v35, %v3439_v37 }
 0x1d4   :  { %v831_v48 = vadd.f32 %v830_v56, %v3539_v9  ;;  %v850_v43 = vadd.f32 %v3549_v18, %v3546_v33  ;;  %v3595_v2 = vmul.f32 %v2144_v35, %v3451_v29  ;;  %v3603_v37 = vmul.f32 %v2144_v35, %v3463_v44 }
 0x1d5   :  { %v3611_v29 = vmul.f32 %v2144_v35, %v3475_v53  ;;  %v3619_v44 = vmul.f32 %v2144_v35, %v3485_v57  ;;  %v3627_v53 = vmul.f32 %v2144_v35, %v3495_v4  ;;  %v3632_v54 = vmul.f32 %v2142_v26, %v3490_v3 }
 0x1d6   :  { %v832_v58 = vadd.f32 %v831_v48, %v3543_v38  ;;  %v851_v40 = vadd.f32 %v850_v43, %v3556_v62  ;;  %v3635_v57 = vmul.f32 %v2144_v35, %v3502_v6  ;;  %v3640_v22 = vmul.f32 %v2144_v35, %v3509_v45  ;;  %v1031_v48 = vld [vmem:[%s4209_s6 + $0x8] sm:$0xff] }
 0x1d7   :  { %v3645_v1 = vmul.f32 %v2144_v35, %v3514_v13  ;;  %v3650_v6 = vmul.f32 %v2144_v35, %v3519_v0  ;;  %1872 = vmatprep.mubr.f32.mxu0 %v1031_v48 }
 0x1d8   :  { %v833_v8 = vadd.f32 %v832_v58, %v3553_v39  ;;  %v852_v61 = vadd.f32 %v851_v40, %v3562_v50 }
 0x1da   :  { %v834_v19 = vadd.f32 %v833_v8, %v3559_v12  ;;  %v853_v27 = vadd.f32 %v852_v61, %v3571_v21 }
 0x1dc   :  { %v835_v49 = vadd.f32 %v834_v19, %v3568_v7  ;;  %v854_v17 = vadd.f32 %v853_v27, %v3579_v63 }
 0x1de   :  { %v836_v14 = vadd.f32 %v835_v49, %v3576_v24  ;;  %v855_v32 = vadd.f32 %v854_v17, %v3587_v55 }
 0x1e0   :  { %v837_v5 = vadd.f32 %v836_v14, %v3584_v25  ;;  %v856_v15 = vadd.f32 %v855_v32, %v3595_v2 }
 0x1e2   :  { %v838_v10 = vadd.f32 %v837_v5, %v3592_v31  ;;  %v857_v52 = vadd.f32 %v856_v15, %v3603_v37 }
 0x1e4   :  { %v839_v60 = vadd.f32 %v838_v10, %v3600_v51  ;;  %v858_v46 = vadd.f32 %v857_v52, %v3611_v29 }
 0x1e6   :  { %v840_v34 = vadd.f32 %v839_v60, %v3608_v11  ;;  %v859_v59 = vadd.f32 %v858_v46, %v3619_v44 }
 0x1e8   :  { %v841_v47 = vadd.f32 %v840_v34, %v3616_v41  ;;  %v860_v30 = vadd.f32 %v859_v59, %v3627_v53 }
 0x1ea   :  { %v842_v4 = vadd.f32 %v841_v47, %v3624_v36  ;;  %v861_v20 = vadd.f32 %v860_v30, %v3635_v57 }
 0x1ec   :  { %v843_v3 = vadd.f32 %v842_v4, %v3632_v54  ;;  %v862_v42 = vadd.f32 %v861_v20, %v3640_v22 }
 0x1ee   :  { %v844_v26 = vrot.slane %v843_v3, 4  ;;  %v863_v45 = vadd.f32 %v862_v42, %v3645_v1 }
 0x1f0   :  { %v845_v56 = vadd.f32 %v844_v26, %v843_v3  ;;  %v864_v13 = vadd.f32 %v863_v45, %v3650_v6 }
 0x1f2   :  { %v846_v58 = vrot.slane %v845_v56, 2  ;;  %v865_v8 = vrot.slane %v864_v13, 4 }
 0x1f4   :  { %v847_v43 = vadd.f32 %v846_v58, %v845_v56  ;;  %v866_v40 = vadd.f32 %v865_v8, %v864_v13 }
 0x1f6   :  { %v848_v19 = vrot.slane %v847_v43, 1  ;;  %v867_v0 = vrot.slane %v866_v40, 2 }
 0x1f8   :  { %v868_v35 = vadd.f32 %v867_v0, %v866_v40  ;;  %v849_v61 = vadd.f32 %v848_v19, %v847_v43 }
 0x1fa   :  { %v869_v49 = vrot.slane %v868_v35, 1 }
 0x1fc   :  { %v870_v27 = vadd.f32 %v869_v49, %v868_v35 }
 0x1fe   :  { %v871_v14 = vadd.f32 %v870_v27, %v849_v61 }
 0x200   :  { %v3658_v17 = vmul.f32 0.00390625, %v871_v14 }
 0x202   :  { %v3662_v5 = vsub.f32 %v3528_v28, %v3658_v17  ;;  %v3666_v32 = vsub.f32 %v3531_v23, %v3658_v17  ;;  %v3670_v10 = vsub.f32 %v3534_v16, %v3658_v17  ;;  %v3674_v15 = vsub.f32 %v3539_v9, %v3658_v17 }
 0x203   :  { %v3678_v60 = vsub.f32 %v3546_v33, %v3658_v17  ;;  %v3682_v28 = vsub.f32 %v3549_v18, %v3658_v17  ;;  %v3690_v16 = vsub.f32 %v3543_v38, %v3658_v17  ;;  %v3694_v9 = vsub.f32 %v3556_v62, %v3658_v17 }
 0x204   :  { %v905_v23 = vmul.f32 %v3662_v5, %v3662_v5  ;;  %v906_v52 = vmul.f32 %v3666_v32, %v3666_v32  ;;  %v907_v33 = vmul.f32 %v3670_v10, %v3670_v10  ;;  %v3700_v18 = vsub.f32 %v3553_v39, %v3658_v17 }
 0x205   :  { %v3704_v34 = vsub.f32 %v3562_v50, %v3658_v17  ;;  %v908_v46 = vmul.f32 %v3674_v15, %v3674_v15  ;;  %v942_v47 = vmul.f32 %v3678_v60, %v3678_v60  ;;  %v943_v62 = vmul.f32 %v3682_v28, %v3682_v28 }
 0x206   :  { %v921_v38 = vadd.f32 %v906_v52, %v905_v23  ;;  %v3714_v59 = vsub.f32 %v3559_v12, %v3658_v17  ;;  %v3718_v39 = vsub.f32 %v3571_v21, %v3658_v17  ;;  %v909_v50 = vmul.f32 %v3690_v16, %v3690_v16 }
 0x207   :  { %v944_v30 = vmul.f32 %v3694_v9, %v3694_v9  ;;  %v3726_v3 = vsub.f32 %v3568_v7, %v3658_v17  ;;  %v3730_v20 = vsub.f32 %v3579_v63, %v3658_v17  ;;  %v910_v12 = vmul.f32 %v3700_v18, %v3700_v18 }
 0x208   :  { %v922_v4 = vadd.f32 %v921_v38, %v907_v33  ;;  %v945_v26 = vmul.f32 %v3704_v34, %v3704_v34  ;;  %v958_v42 = vadd.f32 %v943_v62, %v942_v47  ;;  %v3738_v56 = vsub.f32 %v3576_v24, %v3658_v17 }
 0x209   :  { %v3742_v7 = vsub.f32 %v3587_v55, %v3658_v17  ;;  %v911_v63 = vmul.f32 %v3714_v59, %v3714_v59  ;;  %v946_v48 = vmul.f32 %v3718_v39, %v3718_v39  ;;  %v3750_v13 = vsub.f32 %v3584_v25, %v3658_v17 }
 0x20a   :  { %v923_v21 = vadd.f32 %v922_v4, %v908_v46  ;;  %v959_v58 = vadd.f32 %v958_v42, %v944_v30  ;;  %v3754_v24 = vsub.f32 %v3595_v2, %v3658_v17  ;;  %v912_v55 = vmul.f32 %v3726_v3, %v3726_v3 }
 0x20b   :  { %v947_v8 = vmul.f32 %v3730_v20, %v3730_v20  ;;  %v3762_v19 = vsub.f32 %v3592_v31, %v3658_v17  ;;  %v3766_v25 = vsub.f32 %v3603_v37, %v3658_v17  ;;  %v913_v2 = vmul.f32 %v3738_v56, %v3738_v56 }
 0x20c   :  { %v924_v45 = vadd.f32 %v923_v21, %v909_v50  ;;  %v960_v40 = vadd.f32 %v959_v58, %v945_v26  ;;  %v948_v35 = vmul.f32 %v3742_v7, %v3742_v7  ;;  %v3774_v49 = vsub.f32 %v3600_v51, %v3658_v17 }
 0x20d   :  { %v3778_v31 = vsub.f32 %v3611_v29, %v3658_v17  ;;  %v914_v37 = vmul.f32 %v3750_v13, %v3750_v13  ;;  %v949_v14 = vmul.f32 %v3754_v24, %v3754_v24  ;;  %v3786_v52 = vsub.f32 %v3608_v11, %v3658_v17 }
 0x20e   :  { %v925_v43 = vadd.f32 %v924_v45, %v910_v12  ;;  %v961_v61 = vadd.f32 %v960_v40, %v946_v48  ;;  %v3790_v51 = vsub.f32 %v3619_v44, %v3658_v17  ;;  %v915_v29 = vmul.f32 %v3762_v19, %v3762_v19 }
 0x20f   :  { %v950_v46 = vmul.f32 %v3766_v25, %v3766_v25  ;;  %v3798_v47 = vsub.f32 %v3616_v41, %v3658_v17  ;;  %v3802_v11 = vsub.f32 %v3627_v53, %v3658_v17  ;;  %v916_v44 = vmul.f32 %v3774_v49, %v3774_v49 }
 0x210   :  { %v926_v0 = vadd.f32 %v925_v43, %v911_v63  ;;  %v962_v23 = vadd.f32 %v961_v61, %v947_v8  ;;  %v951_v50 = vmul.f32 %v3778_v31, %v3778_v31  ;;  %v3810_v30 = vsub.f32 %v3624_v36, %v3658_v17 }
 0x211   :  { %v3814_v41 = vsub.f32 %v3635_v57, %v3658_v17  ;;  %v917_v53 = vmul.f32 %v3786_v52, %v3786_v52  ;;  %v952_v21 = vmul.f32 %v3790_v51, %v3790_v51  ;;  %v3822_v42 = vsub.f32 %v3632_v54, %v3658_v17 }
 0x212   :  { %v927_v27 = vadd.f32 %v926_v0, %v912_v55  ;;  %v963_v38 = vadd.f32 %v962_v23, %v948_v35  ;;  %v3826_v36 = vsub.f32 %v3640_v22, %v3658_v17  ;;  %v918_v57 = vmul.f32 %v3798_v47, %v3798_v47 }
 0x213   :  { %v953_v45 = vmul.f32 %v3802_v11, %v3802_v11  ;;  %v3834_v58 = vsub.f32 %v3645_v1, %v3658_v17  ;;  %v919_v54 = vmul.f32 %v3810_v30, %v3810_v30  ;;  %v954_v22 = vmul.f32 %v3814_v41, %v3814_v41 }
 0x214   :  { %v928_v33 = vadd.f32 %v927_v27, %v913_v2  ;;  %v964_v4 = vadd.f32 %v963_v38, %v949_v14  ;;  %v3842_v8 = vsub.f32 %v3650_v6, %v3658_v17  ;;  %v2147_v40 = vmov 0   ;;  %v1337_v2 = vld [vmem:[%s4210_s7] sm:$0xff]  ;;  %v1339_v27 = vld [vmem:[%s4210_s7 + $0x10] sm:$0xff]  ;;  %v1338_v14 = vld [vmem:[%s4210_s7 + $0x8] sm:$0xff] }
 0x215   :  { %2121 = vset.pattern.permute.xlu0 %v2147_v40  ;;  %2122 = vset.pattern.permute.xlu1 %v2147_v40  ;;  %v920_v1 = vmul.f32 %v3822_v42, %v3822_v42  ;;  %v955_v35 = vmul.f32 %v3826_v36, %v3826_v36  ;;  %v956_v6 = vmul.f32 %v3834_v58, %v3834_v58  ;;  %v1347_v40 = vld [vmem:[%s4210_s7 + $0x50] sm:$0xff] }
 0x216   :  { %v929_v62 = vadd.f32 %v928_v33, %v914_v37  ;;  %v965_v26 = vadd.f32 %v964_v4, %v950_v46  ;;  %1355 = vperm.xlu0 %2121, %v1337_v2   ;;  %1365 = vperm.xlu1 %2122, %v1339_v27   ;;  %v1351_v27 = vld [vmem:[%s4210_s7 + $0x70] sm:$0xff] }
 0x218   :  { %v930_v12 = vadd.f32 %v929_v62, %v915_v29  ;;  %v966_v48 = vadd.f32 %v965_v26, %v951_v50  ;;  %v957_v29 = vmul.f32 %v3842_v8, %v3842_v8  ;;  %v1341_v62 = vld [vmem:[%s4210_s7 + $0x20] sm:$0xff] }
 0x21a   :  { %v931_v63 = vadd.f32 %v930_v12, %v916_v44  ;;  %v967_v43 = vadd.f32 %v966_v48, %v952_v21  ;;  %1360 = vperm.xlu0 %2121, %v1338_v14   ;;  %v1340_v44 = vld [vmem:[%s4210_s7 + $0x18] sm:$0xff]  ;;  %v1343_v12 = vld [vmem:[%s4210_s7 + $0x30] sm:$0xff]  ;;  %v1345_v48 = vld [vmem:[%s4210_s7 + $0x40] sm:$0xff] }
 0x21b   :  { %1370 = vperm.xlu1 %2122, %v1340_v44  }
 0x21c   :  { %v932_v55 = vadd.f32 %v931_v63, %v917_v53  ;;  %v968_v61 = vadd.f32 %v967_v43, %v953_v45  ;;  %v1342_v53 = vld [vmem:[%s4210_s7 + $0x28] sm:$0xff]  ;;  %v1344_v45 = vld [vmem:[%s4210_s7 + $0x38] sm:$0xff] }
 0x21d   :  { %v1346_v43 = vld [vmem:[%s4210_s7 + $0x48] sm:$0xff] }
 0x21e   :  { %v933_v0 = vadd.f32 %v932_v55, %v918_v57  ;;  %v969_v17 = vadd.f32 %v968_v61, %v954_v22  ;;  %1375 = vperm.xlu0 %2121, %v1341_v62   ;;  %v1349_v61 = vld [vmem:[%s4210_s7 + $0x60] sm:$0xff] }
 0x21f   :  { %1380 = vperm.xlu1 %2122, %v1342_v53   ;;  %v1485_v62 = vld [vmem:[%s4211_s9 + $0x20] sm:$0xff] }
 0x220   :  { %v934_v37 = vadd.f32 %v933_v0, %v919_v54  ;;  %v970_v33 = vadd.f32 %v969_v17, %v955_v35  ;;  %v1348_v35 = vld [vmem:[%s4210_s7 + $0x58] sm:$0xff]  ;;  %v1350_v17 = vld [vmem:[%s4210_s7 + $0x68] sm:$0xff] }
 0x222   :  { %v935_v23 = vadd.f32 %v934_v37, %v920_v1  ;;  %v971_v38 = vadd.f32 %v970_v33, %v956_v6  ;;  %1385 = vperm.xlu0 %2121, %v1343_v12   ;;  %v1482_v33 = vld [vmem:[%s4211_s9 + $0x8] sm:$0xff] }
 0x223   :  { %1390 = vperm.xlu1 %2122, %v1344_v45   ;;  %v1489_v45 = vld [vmem:[%s4211_s9 + $0x40] sm:$0xff] }
 0x224   :  { %v936_v46 = vrot.slane %v935_v23, 4  ;;  %v972_v4 = vadd.f32 %v971_v38, %v957_v29  ;;  %v1481_v29 = vld [vmem:[%s4211_s9] sm:$0xff]  ;;  %v1484_v38 = vld [vmem:[%s4211_s9 + $0x18] sm:$0xff] }
 0x226   :  { %v937_v50 = vadd.f32 %v936_v46, %v935_v23  ;;  %v973_v26 = vrot.slane %v972_v4, 4  ;;  %1395 = vperm.xlu0 %2121, %v1345_v48   ;;  %v1352_v23 = vld [vmem:[%s4210_s7 + $0x78] sm:$0xff]  ;;  %v1483_v46 = vld [vmem:[%s4211_s9 + $0x10] sm:$0xff] }
 0x227   :  { %1400 = vperm.xlu1 %2122, %v1346_v43  }
 0x228   :  { %v938_v21 = vrot.slane %v937_v50, 2  ;;  %v974_v63 = vadd.f32 %v973_v26, %v972_v4 }
 0x22a   :  { %v939_v57 = vadd.f32 %v938_v21, %v937_v50  ;;  %v975_v55 = vrot.slane %v974_v63, 2  ;;  %1405 = vperm.xlu0 %2121, %v1347_v40   ;;  %v1493_v40 = vld [vmem:[%s4211_s9 + $0x60] sm:$0xff] }
 0x22b   :  { %1410 = vperm.xlu1 %2122, %v1348_v35  }
 0x22c   :  { %v940_v54 = vrot.slane %v939_v57, 1  ;;  %v976_v22 = vadd.f32 %v975_v55, %v974_v63  ;;  %v1491_v55 = vld [vmem:[%s4211_s9 + $0x50] sm:$0xff] }
 0x22e   :  { %v941_v2 = vadd.f32 %v940_v54, %v939_v57  ;;  %v977_v1 = vrot.slane %v976_v22, 1  ;;  %1415 = vperm.xlu0 %2121, %v1349_v61  }
 0x22f   :  { %1420 = vperm.xlu1 %2122, %v1350_v17  }
 0x230   :  { %v978_v0 = vadd.f32 %v977_v1, %v976_v22 }
 0x232   :  { %v979_v37 = vadd.f32 %v978_v0, %v941_v2  ;;  %1425 = vperm.xlu0 %2121, %v1351_v27   ;;  %v1495_v0 = vld [vmem:[%s4211_s9 + $0x70] sm:$0xff] }
 0x233   :  { %1430 = vperm.xlu1 %2122, %v1352_v23  }
 0x234   :  { %v980_v6 = vmul.f32 0.00390625, %v979_v37 }
 0x236   :  { %v981_v14 = vadd.f32 1e-05, %v980_v6  ;;  %1499 = vperm.xlu0 %2121, %v1481_v29   ;;  %v1035_v29 = vld [vmem:[%s4209_s6 + $0x48] sm:$0xff] }
 0x237   :  { %1504 = vperm.xlu1 %2122, %v1482_v33  }
 0x238   :  { %2145 = vrsqrt.f32 %v981_v14  ;;  %v1032_v14 = vld [vmem:[%s4209_s6 + $0x18] sm:$0xff] }
 0x23a   :  { %1509 = vperm.xlu0 %2121, %v1483_v46  }
 0x23b   :  { %1514 = vperm.xlu1 %2122, %v1484_v38   ;;  %v1037_v38 = vld [vmem:[%s4209_s6 + $0x68] sm:$0xff] }
 0x23e   :  { %1519 = vperm.xlu0 %2121, %v1485_v62  }
 0x242   :  { %v3912_v44 = vpop.eup %2145 }
 0x243   :  { %v999_v50 = vmul.f32 %v3912_v44, %v3678_v60  ;;  %v1000_v4 = vmul.f32 %v3912_v44, %v3682_v28  ;;  %v1001_v53 = vmul.f32 %v3912_v44, %v3694_v9  ;;  %v1002_v12 = vmul.f32 %v3912_v44, %v3704_v34  ;;  %v1486_v60 = vld [vmem:[%s4211_s9 + $0x28] sm:$0xff]  ;;  %v1487_v28 = vld [vmem:[%s4211_s9 + $0x30] sm:$0xff] }
 0x244   :  { %v1003_v57 = vmul.f32 %v3912_v44, %v3718_v39  ;;  %v1004_v63 = vmul.f32 %v3912_v44, %v3730_v20  ;;  %v1005_v34 = vmul.f32 %v3912_v44, %v3742_v7  ;;  %v1006_v39 = vmul.f32 %v3912_v44, %v3754_v24  ;;  %1524 = vperm.xlu1 %2122, %v1486_v60   ;;  %v1488_v20 = vld [vmem:[%s4211_s9 + $0x38] sm:$0xff]  ;;  %v1490_v24 = vld [vmem:[%s4211_s9 + $0x48] sm:$0xff] }
 0x245   :  { %v2008_v21 = vpack.c.bf16 %v1000_v4, %v999_v50  ;;  %v2012_v26 = vpack.c.bf16 %v1002_v12, %v1001_v53  ;;  %1529 = vperm.xlu0 %2121, %v1487_v28   ;;  %v1007_v54 = vmul.f32 %v3912_v44, %v3766_v25  ;;  %v1008_v7 = vmul.f32 %v3912_v44, %v3778_v31  ;;  %v1492_v31 = vld [vmem:[%s4211_s9 + $0x58] sm:$0xff]  ;;  %v1039_v4 = vld [vmem:[%s4209_s6 + $0x88] sm:$0xff] }
 0x246   :  { %v2016_v9 = vpack.c.bf16 %v1004_v63, %v1003_v57  ;;  %v2020_v48 = vpack.c.bf16 %v1006_v39, %v1005_v34  ;;  %v1009_v43 = vmul.f32 %v3912_v44, %v3790_v51  ;;  %v1010_v25 = vmul.f32 %v3912_v44, %v3802_v11  ;;  %v1494_v11 = vld [vmem:[%s4211_s9 + $0x68] sm:$0xff]  ;;  %v1017_v39 = vld [vmem:[%s4209_s6 + $0x20] sm:$0xff] }
 0x247   :  { %2009 = vmatprep.subr.bf16.mxu0 %v2008_v21  ;;  %v2024_v22 = vpack.c.bf16 %v1008_v7, %v1007_v54  ;;  %v1011_v1 = vmul.f32 %v3912_v44, %v3814_v41  ;;  %v1012_v51 = vmul.f32 %v3912_v44, %v3826_v36  ;;  %v1013_v61 = vmul.f32 %v3912_v44, %v3834_v58  ;;  %v1496_v36 = vld [vmem:[%s4211_s9 + $0x78] sm:$0xff]  ;;  %v1043_v63 = vld [vmem:[%s4209_s6 + $0xc8] sm:$0xff]  ;;  %v1021_v54 = vld [vmem:[%s4209_s6 + $0x60] sm:$0xff] }
 0x248   :  { %2011 = vmatpush3.bf16.msra.mxu0 %v2008_v21  ;;  %1534 = vperm.xlu1 %2122, %v1488_v20   ;;  %v2028_v2 = vpack.c.bf16 %v1010_v25, %v1009_v43  ;;  %v1014_v41 = vmul.f32 %v3912_v44, %v3842_v8  ;;  %v983_v6 = vmul.f32 %v3912_v44, %v3662_v5  ;;  %v1033_v5 = vld [vmem:[%s4209_s6 + $0x28] sm:$0xff]  ;;  %v1018_v20 = vld [vmem:[%s4209_s6 + $0x30] sm:$0xff]  ;;  %v1027_v25 = vld [vmem:[%s4209_s6 + $0xc0] sm:$0xff] }
 0x249   :  { %2013 = vmatprep.subr.bf16.mxu0 %v2012_v26  ;;  %1539 = vperm.xlu0 %2121, %v1489_v45   ;;  %v2032_v35 = vpack.c.bf16 %v1012_v51, %v1011_v1  ;;  %v984_v17 = vmul.f32 %v3912_v44, %v3666_v32  ;;  %v985_v8 = vmul.f32 %v3912_v44, %v3670_v10  ;;  %v1041_v21 = vld [vmem:[%s4209_s6 + $0xa8] sm:$0xff]  ;;  %v1019_v45 = vld [vmem:[%s4209_s6 + $0x40] sm:$0xff]  ;;  %v1022_v7 = vld [vmem:[%s4209_s6 + $0x70] sm:$0xff] }
 0x24a   :  { %v2036_v37 = vpack.c.bf16 %v1014_v41, %v1013_v61  ;;  %v986_v27 = vmul.f32 %v3912_v44, %v3674_v15  ;;  %v987_v23 = vmul.f32 %v3912_v44, %v3690_v16  ;;  %v988_v10 = vmul.f32 %v3912_v44, %v3700_v18  ;;  %v1034_v15 = vld [vmem:[%s4209_s6 + $0x38] sm:$0xff]  ;;  %v1026_v43 = vld [vmem:[%s4209_s6 + $0xb0] sm:$0xff]  ;;  %v1465_v1 = vld [vmem:[%s4212_s8] sm:$0xff] }
 0x24b   :  { %v2040_v58 = vpack.c.bf16 %v984_v17, %v983_v6  ;;  %v989_v46 = vmul.f32 %v3912_v44, %v3714_v59  ;;  %v990_v16 = vmul.f32 %v3912_v44, %v3726_v3  ;;  %v1036_v18 = vld [vmem:[%s4209_s6 + $0x58] sm:$0xff]  ;;  %v991_v50 = vmul.f32 %v3912_v44, %v3738_v56  ;;  %1984 = vmatprep.mubr.f32.mxu1 %v1465_v1 }
 0x24c   :  { %2015 = vmatpush3.bf16.msra.mxu0 %v2012_v26  ;;  %1544 = vperm.xlu1 %2122, %v1490_v24   ;;  %v2044_v32 = vpack.c.bf16 %v986_v27, %v985_v8  ;;  %v2048_v33 = vpack.c.bf16 %v988_v10, %v987_v23  ;;  %v992_v59 = vmul.f32 %v3912_v44, %v3750_v13  ;;  %v1038_v3 = vld [vmem:[%s4209_s6 + $0x78] sm:$0xff]  ;;  %v1023_v24 = vld [vmem:[%s4209_s6 + $0x80] sm:$0xff] }
 0x24d   :  { %2017 = vmatprep.subr.bf16.mxu0 %v2016_v9  ;;  %1549 = vperm.xlu0 %2121, %v1491_v55   ;;  %v2052_v62 = vpack.c.bf16 %v990_v16, %v989_v46  ;;  %v993_v12 = vmul.f32 %v3912_v44, %v3762_v19  ;;  %v994_v56 = vmul.f32 %v3912_v44, %v3774_v49  ;;  %v1040_v13 = vld [vmem:[%s4209_s6 + $0x98] sm:$0xff]  ;;  %v1024_v55 = vld [vmem:[%s4209_s6 + $0x90] sm:$0xff] }
 0x24e   :  { %v2056_v53 = vpack.c.bf16 %v992_v59, %v991_v50  ;;  %v995_v57 = vmul.f32 %v3912_v44, %v3786_v52  ;;  %v996_v19 = vmul.f32 %v3912_v44, %v3798_v47  ;;  %v1042_v49 = vld [vmem:[%s4209_s6 + $0xb8] sm:$0xff]  ;;  %v997_v28 = vmul.f32 %v3912_v44, %v3810_v30 }
 0x24f   :  { %v2060_v26 = vpack.c.bf16 %v994_v56, %v993_v12  ;;  %v998_v52 = vmul.f32 %v3912_v44, %v3822_v42  ;;  %v1044_v47 = vld [vmem:[%s4209_s6 + $0xd8] sm:$0xff]  ;;  %v1015_v42 = vld [vmem:[%s4209_s6] sm:$0xff]  ;;  %v1016_v44 = vld [vmem:[%s4209_s6 + $0x10] sm:$0xff] }
 0x250   :  { %2019 = vmatpush3.bf16.msra.mxu0 %v2016_v9  ;;  %1554 = vperm.xlu1 %2122, %v1492_v31   ;;  %v2064_v60 = vpack.c.bf16 %v996_v19, %v995_v57  ;;  %v1045_v9 = vld [vmem:[%s4209_s6 + $0xe8] sm:$0xff]  ;;  %v1046_v30 = vld [vmem:[%s4209_s6 + $0xf8] sm:$0xff]  ;;  %v1028_v31 = vld [vmem:[%s4209_s6 + $0xd0] sm:$0xff] }
 0x251   :  { %2021 = vmatprep.subr.bf16.mxu0 %v2020_v48  ;;  %1559 = vperm.xlu0 %2121, %v1493_v40   ;;  %v2068_v34 = vpack.c.bf16 %v998_v52, %v997_v28  ;;  %v1029_v40 = vld [vmem:[%s4209_s6 + $0xe0] sm:$0xff] }
 0x254   :  { %2023 = vmatpush3.bf16.msra.mxu0 %v2020_v48  ;;  %1564 = vperm.xlu1 %2122, %v1494_v11   ;;  %v1020_v48 = vld [vmem:[%s4209_s6 + $0x50] sm:$0xff] }
 0x255   :  { %2025 = vmatprep.subr.bf16.mxu0 %v2024_v22  ;;  %1569 = vperm.xlu0 %2121, %v1495_v0  }
 0x258   :  { %2027 = vmatpush3.bf16.msra.mxu0 %v2024_v22  ;;  %1574 = vperm.xlu1 %2122, %v1496_v36   ;;  %v1025_v22 = vld [vmem:[%s4209_s6 + $0xa0] sm:$0xff] }
 0x259   :  { %2029 = vmatprep.subr.bf16.mxu0 %v2028_v2 }
 0x25c   :  { %2031 = vmatpush3.bf16.msra.mxu0 %v2028_v2  ;;  %v1030_v2 = vld [vmem:[%s4209_s6 + $0xf0] sm:$0xff] }
 0x25d   :  { %2033 = vmatprep.subr.bf16.mxu0 %v2032_v35 }
 0x260   :  { %2035 = vmatpush3.bf16.msra.mxu0 %v2032_v35 }
 0x261   :  { %2037 = vmatprep.subr.bf16.mxu0 %v2036_v37 }
 0x264   :  { %2039 = vmatpush3.bf16.msra.mxu0 %v2036_v37 }
 0x265   :  { %2041 = vmatprep.subr.bf16.mxu0 %v2040_v58 }
 0x267   :  { %1873 = vmatmul.mubr.f32.vlgmr.msra.gmra.mrb[0].mxu0 %v1032_v14 }
 0x268   :  { %2043 = vmatpush3.bf16.msra.mxu0 %v2040_v58  ;;  %1875 = vmatprep.mubr.f32.mxu0 %v1033_v5 }
 0x269   :  { %2045 = vmatprep.subr.bf16.mxu0 %v2044_v32 }
 0x26b   :  { %1876 = vmatmul.mubr.f32.gmra.mrb[2].mxu0 %v1034_v15 }
 0x26c   :  { %2047 = vmatpush3.bf16.msra.mxu0 %v2044_v32  ;;  %1878 = vmatprep.mubr.f32.mxu0 %v1035_v29 }
 0x26d   :  { %2049 = vmatprep.subr.bf16.mxu0 %v2048_v33 }
 0x26f   :  { %1879 = vmatmul.mubr.f32.gmra.mrb[4].mxu0 %v1036_v18 }
 0x270   :  { %2051 = vmatpush3.bf16.msra.mxu0 %v2048_v33  ;;  %1881 = vmatprep.mubr.f32.mxu0 %v1037_v38 }
 0x271   :  { %2053 = vmatprep.subr.bf16.mxu0 %v2052_v62 }
 0x273   :  { %1882 = vmatmul.mubr.f32.gmra.mrb[6].mxu0 %v1038_v3 }
 0x274   :  { %2055 = vmatpush3.bf16.msra.mxu0 %v2052_v62  ;;  %1884 = vmatprep.mubr.f32.mxu0 %v1039_v4 }
 0x275   :  { %2057 = vmatprep.subr.bf16.mxu0 %v2056_v53 }
 0x277   :  { %1885 = vmatmul.mubr.f32.gmra.mrb[8].mxu0 %v1040_v13 }
 0x278   :  { %2059 = vmatpush3.bf16.msra.mxu0 %v2056_v53  ;;  %1887 = vmatprep.mubr.f32.mxu0 %v1041_v21 }
 0x279   :  { %2061 = vmatprep.subr.bf16.mxu0 %v2060_v26 }
 0x27b   :  { %1888 = vmatmul.mubr.f32.gmra.mrb[10].mxu0 %v1042_v49 }
 0x27c   :  { %2063 = vmatpush3.bf16.msra.mxu0 %v2060_v26  ;;  %1890 = vmatprep.mubr.f32.mxu0 %v1043_v63 }
 0x27d   :  { %2065 = vmatprep.subr.bf16.mxu0 %v2064_v60 }
 0x27f   :  { %1891 = vmatmul.mubr.f32.gmra.mrb[12].mxu0 %v1044_v47 }
 0x280   :  { %2067 = vmatpush3.bf16.msra.mxu0 %v2064_v60  ;;  %1893 = vmatprep.mubr.f32.mxu0 %v1045_v9 }
 0x281   :  { %2069 = vmatprep.subr.bf16.mxu0 %v2068_v34 }
 0x283   :  { %1894 = vmatmul.mubr.f32.gmra.mrb[14].mxu0 %v1046_v30 }
 0x284   :  { %2071 = vmatpush3.bf16.msra.mxu0 %v2068_v34  ;;  %1928 = vmatprep.mubr.f32.mxu0 %v1015_v42 }
 0x287   :  { %1929 = vmatmul.mubr.f32.vlgmr.msra.gmra.mrb[0].mxu0 %v1016_v44 }
 0x288   :  { %1931 = vmatprep.mubr.f32.mxu0 %v1017_v39 }
 0x28b   :  { %1932 = vmatmul.mubr.f32.gmra.mrb[2].mxu0 %v1018_v20 }
 0x28c   :  { %1934 = vmatprep.mubr.f32.mxu0 %v1019_v45 }
 0x28f   :  { %1935 = vmatmul.mubr.f32.gmra.mrb[4].mxu0 %v1020_v48 }
 0x290   :  { %1937 = vmatprep.mubr.f32.mxu0 %v1021_v54 }
 0x293   :  { %1938 = vmatmul.mubr.f32.gmra.mrb[6].mxu0 %v1022_v7 }
 0x294   :  { %1940 = vmatprep.mubr.f32.mxu0 %v1023_v24 }
 0x295   :  { %v1366_v51 = vpop.permute.xlu1 %1365  ;;  %v1356_v11 = vpop.permute.xlu0 %1355 }
 0x297   :  { %1941 = vmatmul.mubr.f32.gmra.mrb[8].mxu0 %v1024_v55 }
 0x298   :  { %1943 = vmatprep.mubr.f32.mxu0 %v1025_v22 }
 0x299   :  { %v1361_v35 = vpop.permute.xlu0 %1360 }
 0x29a   :  { %v1371_v0 = vpop.permute.xlu1 %1370 }
 0x29b   :  { %1944 = vmatmul.mubr.f32.gmra.mrb[10].mxu0 %v1026_v43 }
 0x29c   :  { %1946 = vmatprep.mubr.f32.mxu0 %v1027_v25 }
 0x29d   :  { %v1376_v41 = vpop.permute.xlu0 %1375 }
 0x29e   :  { %v1381_v61 = vpop.permute.xlu1 %1380 }
 0x29f   :  { %1947 = vmatmul.mubr.f32.gmra.mrb[12].mxu0 %v1028_v31 }
 0x2a0   :  { %1949 = vmatprep.mubr.f32.mxu0 %v1029_v40 }
 0x2a1   :  { %v1386_v5 = vpop.permute.xlu0 %1385 }
 0x2a2   :  { %v1391_v8 = vpop.permute.xlu1 %1390 }
 0x2a3   :  { %1950 = vmatmul.mubr.f32.gmra.mrb[14].mxu0 %v1030_v2 }
 0x2a5   :  { %v1396_v59 = vpop.permute.xlu0 %1395 }
 0x2a6   :  { %v1401_v38 = vpop.permute.xlu1 %1400 }
 0x2a9   :  { %v1406_v63 = vpop.permute.xlu0 %1405 }
 0x2aa   :  { %v1411_v57 = vpop.permute.xlu1 %1410 }
 0x2ad   :  { %v1416_v48 = vpop.permute.xlu0 %1415 }
 0x2ae   :  { %v1421_v39 = vpop.permute.xlu1 %1420 }
 0x2b2   :  { %v1431_v40 = vpop.permute.xlu1 %1430 }
 0x35a   :  { %v1930_v36 = vpop.f32.mrb[0].mxu0 }
 0x35b   :  { %v1434_v37 = vadd.f32 %v1930_v36, %v1361_v35  ;;  %v1258_v6 = vpop.f32.mrb[1].mxu0 }
 0x35c   :  { %v1433_v17 = vadd.f32 %v1356_v11, %v1258_v6  ;;  %v1466_v6 = vld [vmem:[%s4212_s8 + $0x8] sm:$0xff] }
 0x35d   :  { %v1450_v58 = vmax.f32 %v1434_v37, 0.0 }
 0x35e   :  { %v1449_v27 = vmax.f32 %v1433_v17, 0.0  ;;  %v1933_v14 = vpop.f32.mrb[2].mxu0  ;;  %v1467_v17 = vld [vmem:[%s4212_s8 + $0x10] sm:$0xff] }
 0x35f   :  { %v1436_v32 = vadd.f32 %v1933_v14, %v1371_v0  ;;  %v1268_v23 = vpop.f32.mrb[3].mxu0  ;;  %v1471_v14 = vld [vmem:[%s4212_s8 + $0x30] sm:$0xff] }
 0x360   :  { %v1435_v10 = vadd.f32 %v1366_v51, %v1268_v23  ;;  %v2072_v15 = vpack.c.bf16 %v1450_v58, %v1449_v27  ;;  %v1426_v51 = vpop.permute.xlu0 %1425  ;;  %v1468_v58 = vld [vmem:[%s4212_s8 + $0x18] sm:$0xff]  ;;  %v1470_v27 = vld [vmem:[%s4212_s8 + $0x28] sm:$0xff] }
 0x361   :  { %v1452_v29 = vmax.f32 %v1436_v32, 0.0  ;;  %v1473_v32 = vld [vmem:[%s4212_s8 + $0x40] sm:$0xff]  ;;  %v1474_v23 = vld [vmem:[%s4212_s8 + $0x48] sm:$0xff] }
 0x362   :  { %v1451_v33 = vmax.f32 %v1435_v10, 0.0  ;;  %v1936_v46 = vpop.f32.mrb[4].mxu0  ;;  %2073 = vmatprep.subr.bf16.mxu1 %v2072_v15  ;;  %v1475_v10 = vld [vmem:[%s4212_s8 + $0x50] sm:$0xff] }
 0x363   :  { %v1438_v16 = vadd.f32 %v1936_v46, %v1381_v61  ;;  %v1278_v18 = vpop.f32.mrb[5].mxu0  ;;  %2075 = vmatpush3.bf16.msra.mxu1 %v2072_v15  ;;  %v1476_v15 = vld [vmem:[%s4212_s8 + $0x58] sm:$0xff]  ;;  %v1479_v46 = vld [vmem:[%s4212_s8 + $0x70] sm:$0xff] }
 0x364   :  { %v2076_v62 = vpack.c.bf16 %v1452_v29, %v1451_v33  ;;  %v1437_v50 = vadd.f32 %v1376_v41, %v1278_v18  ;;  %v1477_v29 = vld [vmem:[%s4212_s8 + $0x60] sm:$0xff]  ;;  %v1478_v33 = vld [vmem:[%s4212_s8 + $0x68] sm:$0xff]  ;;  %v1505_v18 = vpop.permute.xlu1 %1504 }
 0x365   :  { %v1454_v3 = vmax.f32 %v1438_v16, 0.0  ;;  %v1480_v16 = vld [vmem:[%s4212_s8 + $0x78] sm:$0xff] }
 0x366   :  { %v1453_v4 = vmax.f32 %v1437_v50, 0.0  ;;  %v1939_v53 = vpop.f32.mrb[6].mxu0  ;;  %2077 = vmatprep.subr.bf16.mxu1 %v2076_v62 }
 0x367   :  { %v1440_v12 = vadd.f32 %v1939_v53, %v1391_v8  ;;  %v1288_v56 = vpop.f32.mrb[7].mxu0  ;;  %2079 = vmatpush3.bf16.msra.mxu1 %v2076_v62  ;;  %v1469_v8 = vld [vmem:[%s4212_s8 + $0x20] sm:$0xff] }
 0x368   :  { %v2080_v13 = vpack.c.bf16 %v1454_v3, %v1453_v4  ;;  %v1439_v21 = vadd.f32 %v1386_v5, %v1288_v56  ;;  %v1472_v5 = vld [vmem:[%s4212_s8 + $0x38] sm:$0xff]  ;;  %v1515_v62 = vpop.permute.xlu1 %1514 }
 0x369   :  { %v1456_v26 = vmax.f32 %v1440_v12, 0.0 }
 0x36a   :  { %v1455_v19 = vmax.f32 %v1439_v21, 0.0  ;;  %v1942_v49 = vpop.f32.mrb[8].mxu0  ;;  %2081 = vmatprep.subr.bf16.mxu1 %v2080_v13 }
 0x36b   :  { %v1442_v60 = vadd.f32 %v1942_v49, %v1401_v38  ;;  %v1298_v28 = vpop.f32.mrb[9].mxu0  ;;  %2083 = vmatpush3.bf16.msra.mxu1 %v2080_v13  ;;  %v1500_v38 = vpop.permute.xlu0 %1499 }
 0x36c   :  { %v2084_v52 = vpack.c.bf16 %v1456_v26, %v1455_v19  ;;  %v1441_v47 = vadd.f32 %v1396_v59, %v1298_v28  ;;  %v1525_v59 = vpop.permute.xlu1 %1524 }
 0x36d   :  { %v1458_v9 = vmax.f32 %v1442_v60, 0.0 }
 0x36e   :  { %v1457_v34 = vmax.f32 %v1441_v47, 0.0  ;;  %v1945_v30 = vpop.f32.mrb[10].mxu0  ;;  %2085 = vmatprep.subr.bf16.mxu1 %v2084_v52 }
 0x36f   :  { %v1444_v42 = vadd.f32 %v1945_v30, %v1411_v57  ;;  %v1308_v44 = vpop.f32.mrb[11].mxu0  ;;  %2087 = vmatpush3.bf16.msra.mxu1 %v2084_v52  ;;  %v1510_v50 = vpop.permute.xlu0 %1509 }
 0x370   :  { %v2088_v20 = vpack.c.bf16 %v1458_v9, %v1457_v34  ;;  %v1443_v45 = vadd.f32 %v1406_v63, %v1308_v44  ;;  %v1535_v13 = vpop.permute.xlu1 %1534 }
 0x371   :  { %v1460_v54 = vmax.f32 %v1444_v42, 0.0 }
 0x372   :  { %v1459_v7 = vmax.f32 %v1443_v45, 0.0  ;;  %v1948_v24 = vpop.f32.mrb[12].mxu0  ;;  %2089 = vmatprep.subr.bf16.mxu1 %v2088_v20 }
 0x373   :  { %v1446_v55 = vadd.f32 %v1948_v24, %v1421_v39  ;;  %v1318_v22 = vpop.f32.mrb[13].mxu0  ;;  %2091 = vmatpush3.bf16.msra.mxu1 %v2088_v20  ;;  %v1520_v3 = vpop.permute.xlu0 %1519 }
 0x374   :  { %v2092_v43 = vpack.c.bf16 %v1460_v54, %v1459_v7  ;;  %v1445_v25 = vadd.f32 %v1416_v48, %v1318_v22  ;;  %v1545_v52 = vpop.permute.xlu1 %1544 }
 0x375   :  { %v1462_v31 = vmax.f32 %v1446_v55, 0.0 }
 0x376   :  { %v1461_v2 = vmax.f32 %v1445_v25, 0.0  ;;  %v1951_v1 = vpop.f32.mrb[14].mxu0  ;;  %2093 = vmatprep.subr.bf16.mxu1 %v2092_v43 }
 0x377   :  { %v1448_v11 = vadd.f32 %v1951_v1, %v1431_v40  ;;  %v1328_v0 = vpop.f32.mrb[15].mxu0  ;;  %2095 = vmatpush3.bf16.msra.mxu1 %v2092_v43  ;;  %v1530_v26 = vpop.permute.xlu0 %1529 }
 0x378   :  { %v2096_v35 = vpack.c.bf16 %v1462_v31, %v1461_v2  ;;  %v1447_v61 = vadd.f32 %v1426_v51, %v1328_v0  ;;  %v1555_v39 = vpop.permute.xlu1 %1554 }
 0x379   :  { %v1464_v41 = vmax.f32 %v1448_v11, 0.0 }
 0x37a   :  { %v1463_v36 = vmax.f32 %v1447_v61, 0.0  ;;  %2097 = vmatprep.subr.bf16.mxu1 %v2096_v35 }
 0x37b   :  { %2099 = vmatpush3.bf16.msra.mxu1 %v2096_v35  ;;  %v1540_v9 = vpop.permute.xlu0 %1539 }
 0x37c   :  { %v2100_v37 = vpack.c.bf16 %v1464_v41, %v1463_v36  ;;  %v1565_v43 = vpop.permute.xlu1 %1564 }
 0x37e   :  { %2101 = vmatprep.subr.bf16.mxu1 %v2100_v37 }
 0x37f   :  { %2103 = vmatpush3.bf16.msra.mxu1 %v2100_v37  ;;  %v1550_v45 = vpop.permute.xlu0 %1549 }
 0x380   :  { %v1575_v11 = vpop.permute.xlu1 %1574 }
 0x382   :  { %1985 = vmatmul.mubr.f32.vlgmr.msra.gmra.mrb[0].mxu1 %v1466_v6 }
 0x383   :  { %1987 = vmatprep.mubr.f32.mxu1 %v1467_v17  ;;  %v1560_v31 = vpop.permute.xlu0 %1559 }
 0x386   :  { %1988 = vmatmul.mubr.f32.gmra.mrb[2].mxu1 %v1468_v58 }
 0x387   :  { %1990 = vmatprep.mubr.f32.mxu1 %v1469_v8  ;;  %v1570_v35 = vpop.permute.xlu0 %1569 }
 0x38a   :  { %1991 = vmatmul.mubr.f32.gmra.mrb[4].mxu1 %v1470_v27 }
 0x38b   :  { %1993 = vmatprep.mubr.f32.mxu1 %v1471_v14 }
 0x38e   :  { %1994 = vmatmul.mubr.f32.gmra.mrb[6].mxu1 %v1472_v5 }
 0x38f   :  { %1996 = vmatprep.mubr.f32.mxu1 %v1473_v32 }
 0x392   :  { %1997 = vmatmul.mubr.f32.gmra.mrb[8].mxu1 %v1474_v23 }
 0x393   :  { %1999 = vmatprep.mubr.f32.mxu1 %v1475_v10 }
 0x396   :  { %2000 = vmatmul.mubr.f32.gmra.mrb[10].mxu1 %v1476_v15 }
 0x397   :  { %2002 = vmatprep.mubr.f32.mxu1 %v1477_v29 }
 0x39a   :  { %2003 = vmatmul.mubr.f32.gmra.mrb[12].mxu1 %v1478_v33 }
 0x39b   :  { %2005 = vmatprep.mubr.f32.mxu1 %v1479_v46 }
 0x39e   :  { %2006 = vmatmul.mubr.f32.gmra.mrb[14].mxu1 %v1480_v16 }
 0x455   :  { %v1986_v4 = vpop.f32.mrb[0].mxu1 }
 0x456   :  { %v1649_v53 = vadd.f32 %v1986_v4, %v1505_v18  ;;  %v1643_v12 = vpop.f32.mrb[1].mxu1 }
 0x457   :  { %v1644_v56 = vadd.f32 %v1643_v12, %v1500_v38 }
 0x458   :  { %1723 = vst [vmem:[%s4213_s10 + $0x8] sm:$0xff] %v1649_v53 }
 0x459   :  { %1722 = vst [vmem:[%s4213_s10] sm:$0xff] %v1644_v56  ;;  %v1989_v21 = vpop.f32.mrb[2].mxu1 }
 0x45a   :  { %v1659_v57 = vadd.f32 %v1989_v21, %v1515_v62  ;;  %v1653_v19 = vpop.f32.mrb[3].mxu1 }
 0x45b   :  { %v1654_v49 = vadd.f32 %v1653_v19, %v1510_v50 }
 0x45c   :  { %1725 = vst [vmem:[%s4213_s10 + $0x18] sm:$0xff] %v1659_v57 }
 0x45d   :  { %1724 = vst [vmem:[%s4213_s10 + $0x10] sm:$0xff] %v1654_v49  ;;  %v1992_v63 = vpop.f32.mrb[4].mxu1 }
 0x45e   :  { %v1669_v60 = vadd.f32 %v1992_v63, %v1525_v59  ;;  %v1663_v28 = vpop.f32.mrb[5].mxu1 }
 0x45f   :  { %v1664_v47 = vadd.f32 %v1663_v28, %v1520_v3 }
 0x460   :  { %1727 = vst [vmem:[%s4213_s10 + $0x28] sm:$0xff] %v1669_v60 }
 0x461   :  { %1726 = vst [vmem:[%s4213_s10 + $0x20] sm:$0xff] %v1664_v47  ;;  %v1995_v34 = vpop.f32.mrb[6].mxu1 }
 0x462   :  { %v1679_v30 = vadd.f32 %v1995_v34, %v1535_v13  ;;  %v1673_v42 = vpop.f32.mrb[7].mxu1 }
 0x463   :  { %v1674_v44 = vadd.f32 %v1673_v42, %v1530_v26 }
 0x464   :  { %1729 = vst [vmem:[%s4213_s10 + $0x38] sm:$0xff] %v1679_v30 }
 0x465   :  { %1728 = vst [vmem:[%s4213_s10 + $0x30] sm:$0xff] %v1674_v44  ;;  %v1998_v20 = vpop.f32.mrb[8].mxu1 }
 0x466   :  { %v1689_v48 = vadd.f32 %v1998_v20, %v1545_v52  ;;  %v1683_v54 = vpop.f32.mrb[9].mxu1 }
 0x467   :  { %v1684_v7 = vadd.f32 %v1683_v54, %v1540_v9 }
 0x468   :  { %1731 = vst [vmem:[%s4213_s10 + $0x48] sm:$0xff] %v1689_v48 }
 0x469   :  { %1730 = vst [vmem:[%s4213_s10 + $0x40] sm:$0xff] %v1684_v7  ;;  %v2001_v24 = vpop.f32.mrb[10].mxu1 }
 0x46a   :  { %v1699_v55 = vadd.f32 %v2001_v24, %v1555_v39  ;;  %v1693_v22 = vpop.f32.mrb[11].mxu1 }
 0x46b   :  { %v1694_v25 = vadd.f32 %v1693_v22, %v1550_v45 }
 0x46c   :  { %1733 = vst [vmem:[%s4213_s10 + $0x58] sm:$0xff] %v1699_v55 }
 0x46d   :  { %1732 = vst [vmem:[%s4213_s10 + $0x50] sm:$0xff] %v1694_v25  ;;  %v2004_v40 = vpop.f32.mrb[12].mxu1 }
 0x46e   :  { %v1709_v2 = vadd.f32 %v2004_v40, %v1565_v43  ;;  %v1703_v1 = vpop.f32.mrb[13].mxu1 }
 0x46f   :  { %v1704_v51 = vadd.f32 %v1703_v1, %v1560_v31 }
 0x470   :  { %1735 = vst [vmem:[%s4213_s10 + $0x68] sm:$0xff] %v1709_v2 }
 0x471   :  { %1734 = vst [vmem:[%s4213_s10 + $0x60] sm:$0xff] %v1704_v51  ;;  %v2007_v0 = vpop.f32.mrb[14].mxu1 }
 0x472   :  { %v1719_v61 = vadd.f32 %v2007_v0, %v1575_v11  ;;  %v1713_v41 = vpop.f32.mrb[15].mxu1 }
 0x473   :  { %v1714_v36 = vadd.f32 %v1713_v41, %v1570_v35 }
 0x474   :  { %1737 = vst [vmem:[%s4213_s10 + $0x78] sm:$0xff] %v1719_v61 }
 0x475   :  { %1736 = vst [vmem:[%s4213_s10 + $0x70] sm:$0xff] %v1714_v36 }

</bundles_post_ra>
